<compile_context>
chip_gen: v6e
topology: v6e:2x2x1
jax: 0.10.0
libtpu: 0.0.40
codegen_flags: <defaults>
</compile_context>

<pallas_src>
import numpy as np
import jax
import jax.numpy as jnp
from jax import lax
from jax.experimental import pallas as pl
from jax.experimental.pallas import tpu as pltpu

TN   = 8            # samples per grid step (== sublane count)
POS  = 144          # 12*12 pooled output positions per sample
TAPS = 32           # 25 conv taps (5x5) padded to 32
NCH  = 8            # 6 conv channels padded to 8 sublanes
FLAT = 896          # 6*144 = 864 flattened features padded to 7*128
HID  = 256          # 200 hidden units padded
NOUT = 128          # 10 logits padded
SLAB = TN * POS     # 1152 = 9*128: lane-aligned quadrant slab width


# ------------------------------ Pallas kernel -------------------------------

def fused_convnet_kernel(p_ref, wc_ref, bc_ref, w1_ref, b1_ref, w2_ref, b2_ref,
                         o_ref, conv_ref, act_ref, flat_ref):
    # conv1 as a single MXU matmul over all 4 pool quadrants and TN samples:
    #   (8ch, 32taps) @ (32taps, 4*TN*144) -> (8, 4608), kept in VMEM scratch.
    conv_ref[...] = jnp.dot(wc_ref[...], p_ref[0],
                            preferred_element_type=jnp.float32)

    # 2x2 max-pool = elementwise max over the four 128-aligned quadrant slabs,
    # then per-channel bias + ReLU (both commute with the max).
    q0 = conv_ref[:, 0 * SLAB:1 * SLAB]
    q1 = conv_ref[:, 1 * SLAB:2 * SLAB]
    q2 = conv_ref[:, 2 * SLAB:3 * SLAB]
    q3 = conv_ref[:, 3 * SLAB:4 * SLAB]
    pooled = jnp.maximum(jnp.maximum(q0, q1), jnp.maximum(q2, q3))
    act_ref[...] = jnp.maximum(pooled + bc_ref[...], 0.0)      # (8, TN*144)

    # Re-layout (channel, sample*pos) -> (sample, channel*pos) rows entirely in
    # VMEM (matches torch's out.view(-1, 6*12*12) ordering). 48 small slab
    # copies; no reshape/transpose ops, no HBM traffic.
    flat_ref[...] = jnp.zeros_like(flat_ref)                    # zero pad cols
    for ln in range(TN):
        for c in range(6):
            flat_ref[ln:ln + 1, c * POS:(c + 1) * POS] = (
                act_ref[c:c + 1, ln * POS:(ln + 1) * POS])

    # fc1 + ReLU + fc2, all MXU-/lane-aligned (padded rows/cols are zero).
    h = jnp.dot(flat_ref[...], w1_ref[...],
                preferred_element_type=jnp.float32)             # (TN, 256)
    h = jnp.maximum(h + b1_ref[...], 0.0)
    o_ref[...] = jnp.dot(h, w2_ref[...],
                         preferred_element_type=jnp.float32) + b2_ref[...]


# ------------------------------ JAX wrapper ----------------------------------

def _im2col_quadrants(x2, nt):
    """(nt*TN, 28, 28) -> (nt, 32, 4*TN*144) pool-quadrant im2col (pure glue)."""
    n_pad = nt * TN
    taps = [x2[:, kh:kh + 24, kw:kw + 24]                       # (n_pad, 24, 24)
            for kh in range(5) for kw in range(5)]
    pat = jnp.stack(taps, axis=1)                               # (n, 25, 24, 24)
    pat = pat.reshape(n_pad, 25, 12, 2, 12, 2)                  # h=2*ph+a, w=2*pw+b
    pat = pat.transpose(3, 5, 1, 0, 2, 4)                       # (a, b, t, n, ph, pw)
    pat = pat.reshape(4, 25, n_pad, POS)
    pat = jnp.pad(pat, ((0, 0), (0, TAPS - 25), (0, 0), (0, 0)))
    pat = pat.reshape(4, TAPS, nt, TN, POS)
    pat = pat.transpose(2, 1, 0, 3, 4)                          # (nt, t, q, ln, p)
    return pat.reshape(nt, TAPS, 4 * TN * POS)


def convnet_forward(x, params):
    wc, bc, w1, b1, w2, b2 = params
    N = x.shape[0]
    nt = (N + TN - 1) // TN
    n_pad = nt * TN

    x2 = x[:, 0]                                                # (N, 28, 28)
    if n_pad != N:
        x2 = jnp.pad(x2, ((0, n_pad - N), (0, 0), (0, 0)))
    p_arr = _im2col_quadrants(x2, nt)

    # One-time zero padding of the tiny weights to lane-/MXU-friendly shapes.
    wcp = jnp.zeros((NCH, TAPS), jnp.float32).at[:6, :25].set(wc.reshape(6, 25))
    bcp = jnp.zeros((NCH, 1), jnp.float32).at[:6, 0].set(bc)
    w1p = jnp.zeros((FLAT, HID), jnp.float32).at[:864, :200].set(w1)
    b1p = jnp.zeros((1, HID), jnp.float32).at[0, :200].set(b1)
    w2p = jnp.zeros((HID, NOUT), jnp.float32).at[:200, :10].set(w2)
    b2p = jnp.zeros((1, NOUT), jnp.float32).at[0, :10].set(b2)

    out = pl.pallas_call(
        fused_convnet_kernel,
        out_shape=jax.ShapeDtypeStruct((n_pad, NOUT), jnp.float32),
        grid=(nt,),
        in_specs=[
            pl.BlockSpec((1, TAPS, 4 * TN * POS), lambda i: (i, 0, 0)),  # im2col
            pl.BlockSpec((NCH, TAPS), lambda i: (0, 0)),                 # conv W
            pl.BlockSpec((NCH, 1), lambda i: (0, 0)),                    # conv b
            pl.BlockSpec((FLAT, HID), lambda i: (0, 0)),                 # fc1 W
            pl.BlockSpec((1, HID), lambda i: (0, 0)),                    # fc1 b
            pl.BlockSpec((HID, NOUT), lambda i: (0, 0)),                 # fc2 W
            pl.BlockSpec((1, NOUT), lambda i: (0, 0)),                   # fc2 b
        ],
        out_specs=pl.BlockSpec((TN, NOUT), lambda i: (i, 0)),
        scratch_shapes=[
            pltpu.VMEM((NCH, 4 * TN * POS), jnp.float32),  # raw conv output
            pltpu.VMEM((NCH, TN * POS), jnp.float32),      # pooled activations
            pltpu.VMEM((TN, FLAT), jnp.float32),           # flattened rows
        ],
        compiler_params=pltpu.CompilerParams(
            dimension_semantics=("parallel",)),
    )(p_arr, wcp, bcp, w1p, b1p, w2p, b2p)

    return out[:N, :10]


# ----------------------------- pure-JAX reference ----------------------------

def reference_forward(x, params):
    wc, bc, w1, b1, w2, b2 = params
    conv = lax.conv_general_dilated(
        x, wc[:, None, :, :], window_strides=(1, 1), padding="VALID",
        dimension_numbers=("NCHW", "OIHW", "NCHW"))
    conv = jnp.maximum(conv + bc[None, :, None, None], 0.0)
    pooled = lax.reduce_window(conv, -jnp.inf, lax.max,
                               (1, 1, 2, 2), (1, 1, 2, 2), "VALID")
    flat = pooled.reshape(x.shape[0], -1)
    h = jnp.maximum(flat @ w1 + b1[None, :], 0.0)
    return h @ w2 + b2[None, :]


# ---------------------------------- main -------------------------------------

if __name__ == "__main__":
    key = jax.random.PRNGKey(0)
    kx, kwc, kbc, kw1, kb1, kw2, kb2 = jax.random.split(key, 7)

    # Deterministic synthetic parameters (shapes from Convnet.__init__).
    wc = 0.1 * jax.random.normal(kwc, (6, 5, 5), jnp.float32)       # conv1.weight (in_ch=1)
    bc = 0.1 * jax.random.normal(kbc, (6,), jnp.float32)            # conv1.bias
    w1 = 0.05 * jax.random.normal(kw1, (864, 200), jnp.float32)     # fc1.weight^T
    b1 = 0.05 * jax.random.normal(kb1, (200,), jnp.float32)         # fc1.bias
    w2 = 0.05 * jax.random.normal(kw2, (200, 10), jnp.float32)      # fc2.weight^T
    b2 = 0.05 * jax.random.normal(kb2, (10,), jnp.float32)          # fc2.bias
    params = (wc, bc, w1, b1, w2, b2)

    # Batch of 12 MNIST-sized images (exercises batch padding 12 -> 16 and a
    # 2-step "parallel" grid).
    x = jax.random.normal(kx, (12, 1, 28, 28), jnp.float32)

    fwd = jax.jit(lambda xx: convnet_forward(xx, params))
    out = jax.block_until_ready(fwd(x))
    ref = jax.block_until_ready(reference_forward(x, params))

    assert out.shape == (12, 10) and out.dtype == jnp.float32
    np.testing.assert_allclose(np.asarray(out), np.asarray(ref),
                               rtol=1e-3, atol=1e-3)
    print("KERNEL_OK")
</pallas_src>

<mosaic_0001>
module attributes {stable_mosaic.version = 11 : i64} {
  func.func @fused_convnet_kernel(%arg0: i32, %arg1: memref<1x32x4608xf32, #tpu.memory_space<vmem>>, %arg2: memref<8x32xf32, #tpu.memory_space<vmem>>, %arg3: memref<8x1xf32, #tpu.memory_space<vmem>>, %arg4: memref<896x256xf32, #tpu.memory_space<vmem>>, %arg5: memref<1x256xf32, #tpu.memory_space<vmem>>, %arg6: memref<256x128xf32, #tpu.memory_space<vmem>>, %arg7: memref<1x128xf32, #tpu.memory_space<vmem>>, %arg8: memref<8x128xf32, #tpu.memory_space<vmem>>, %arg9: memref<8x4608xf32, #tpu.memory_space<vmem>>, %arg10: memref<8x1152xf32, #tpu.memory_space<vmem>>, %arg11: memref<8x896xf32, #tpu.memory_space<vmem>>) attributes {dimension_semantics = [#tpu.dimension_semantics<parallel>], iteration_bounds = array<i64: 2>, scalar_prefetch = 0 : i64, scratch_operands = 3 : i64, tpu.core_type = #tpu.core_type<tc>, window_params = [{transform_indices = @transform_0, window_bounds = array<i64: 1, 32, 4608>}, {pipeline_mode = #tpu.pipeline_mode<synchronous>, transform_indices = @transform_1, window_bounds = array<i64: 8, 32>}, {pipeline_mode = #tpu.pipeline_mode<synchronous>, transform_indices = @transform_2, window_bounds = array<i64: 8, 1>}, {pipeline_mode = #tpu.pipeline_mode<synchronous>, transform_indices = @transform_3, window_bounds = array<i64: 896, 256>}, {pipeline_mode = #tpu.pipeline_mode<synchronous>, transform_indices = @transform_4, window_bounds = array<i64: 1, 256>}, {pipeline_mode = #tpu.pipeline_mode<synchronous>, transform_indices = @transform_5, window_bounds = array<i64: 256, 128>}, {pipeline_mode = #tpu.pipeline_mode<synchronous>, transform_indices = @transform_6, window_bounds = array<i64: 1, 128>}, {transform_indices = @transform_7, window_bounds = array<i64: 8, 128>}]} {
    %c0 = arith.constant 0 : index
    %c0_0 = arith.constant 0 : index
    %0 = vector.load %arg2[%c0, %c0_0] : memref<8x32xf32, #tpu.memory_space<vmem>>, vector<8x32xf32>
    %c0_1 = arith.constant 0 : index
    %c0_2 = arith.constant 0 : index
    %c0_3 = arith.constant 0 : index
    %1 = vector.load %arg1[%c0_1, %c0_2, %c0_3] : memref<1x32x4608xf32, #tpu.memory_space<vmem>>, vector<1x32x4608xf32>
    %2 = vector.shape_cast %1 : vector<1x32x4608xf32> to vector<32x4608xf32>
    %cst = arith.constant dense<0.000000e+00> : vector<8x4608xf32>
    %3 = tpu.matmul %0, %2, %cst {dimension_numbers = #tpu.dot_dimension_numbers<[1], [0], [0], [1], [0, 0, 1, 1], [], []>} : vector<8x32xf32>, vector<32x4608xf32>, vector<8x4608xf32> -> vector<8x4608xf32>
    %c0_4 = arith.constant 0 : index
    %c0_5 = arith.constant 0 : index
    %4 = vector.load %arg9[%c0_4, %c0_5] : memref<8x4608xf32, #tpu.memory_space<vmem>>, vector<8x4608xf32>
    tpu.vector_store %arg9[%c0_4, %c0_5], %3 {strides = array<i32>} : memref<8x4608xf32, #tpu.memory_space<vmem>>, vector<8x4608xf32>,
    %c0_6 = arith.constant 0 : index
    %c0_7 = arith.constant 0 : index
    %5 = vector.load %arg9[%c0_6, %c0_7] : memref<8x4608xf32, #tpu.memory_space<vmem>>, vector<8x1152xf32>
    %c0_8 = arith.constant 0 : index
    %c1152 = arith.constant 1152 : index
    %6 = vector.load %arg9[%c0_8, %c1152] : memref<8x4608xf32, #tpu.memory_space<vmem>>, vector<8x1152xf32>
    %c0_9 = arith.constant 0 : index
    %c2304 = arith.constant 2304 : index
    %7 = vector.load %arg9[%c0_9, %c2304] : memref<8x4608xf32, #tpu.memory_space<vmem>>, vector<8x1152xf32>
    %c0_10 = arith.constant 0 : index
    %c3456 = arith.constant 3456 : index
    %8 = vector.load %arg9[%c0_10, %c3456] : memref<8x4608xf32, #tpu.memory_space<vmem>>, vector<8x1152xf32>
    %9 = arith.maximumf %5, %6 : vector<8x1152xf32>
    %10 = arith.maximumf %7, %8 : vector<8x1152xf32>
    %11 = arith.maximumf %9, %10 : vector<8x1152xf32>
    %c0_11 = arith.constant 0 : index
    %c0_12 = arith.constant 0 : index
    %12 = vector.load %arg3[%c0_11, %c0_12] : memref<8x1xf32, #tpu.memory_space<vmem>>, vector<8x1xf32>
    %13 = vector.broadcast %12 : vector<8x1xf32> to vector<8x1152xf32>
    %14 = arith.addf %11, %13 : vector<8x1152xf32>
    %cst_13 = arith.constant 0.000000e+00 : f32
    %15 = vector.broadcast %cst_13 : f32 to vector<8x1152xf32>
    %16 = arith.maximumf %14, %15 : vector<8x1152xf32>
    %c0_14 = arith.constant 0 : index
    %c0_15 = arith.constant 0 : index
    %17 = vector.load %arg10[%c0_14, %c0_15] : memref<8x1152xf32, #tpu.memory_space<vmem>>, vector<8x1152xf32>
    tpu.vector_store %arg10[%c0_14, %c0_15], %16 {strides = array<i32>} : memref<8x1152xf32, #tpu.memory_space<vmem>>, vector<8x1152xf32>,
    %cst_16 = arith.constant 0.000000e+00 : f32
    %18 = vector.broadcast %cst_16 : f32 to vector<8x896xf32>
    %c0_17 = arith.constant 0 : index
    %c0_18 = arith.constant 0 : index
    %19 = vector.load %arg11[%c0_17, %c0_18] : memref<8x896xf32, #tpu.memory_space<vmem>>, vector<8x896xf32>
    tpu.vector_store %arg11[%c0_17, %c0_18], %18 {strides = array<i32>} : memref<8x896xf32, #tpu.memory_space<vmem>>, vector<8x896xf32>,
    %c0_19 = arith.constant 0 : index
    %c0_20 = arith.constant 0 : index
    %20 = vector.load %arg10[%c0_19, %c0_20] : memref<8x1152xf32, #tpu.memory_space<vmem>>, vector<1x144xf32>
    %c0_21 = arith.constant 0 : index
    %c0_22 = arith.constant 0 : index
    %21 = vector.load %arg11[%c0_21, %c0_22] : memref<8x896xf32, #tpu.memory_space<vmem>>, vector<1x144xf32>
    tpu.vector_store %arg11[%c0_21, %c0_22], %20 {strides = array<i32>} : memref<8x896xf32, #tpu.memory_space<vmem>>, vector<1x144xf32>,
    %c1 = arith.constant 1 : index
    %c0_23 = arith.constant 0 : index
    %22 = vector.load %arg10[%c1, %c0_23] : memref<8x1152xf32, #tpu.memory_space<vmem>>, vector<1x144xf32>
    %c0_24 = arith.constant 0 : index
    %c144 = arith.constant 144 : index
    %23 = vector.load %arg11[%c0_24, %c144] : memref<8x896xf32, #tpu.memory_space<vmem>>, vector<1x144xf32>
    tpu.vector_store %arg11[%c0_24, %c144], %22 {strides = array<i32>} : memref<8x896xf32, #tpu.memory_space<vmem>>, vector<1x144xf32>,
    %c2 = arith.constant 2 : index
    %c0_25 = arith.constant 0 : index
    %24 = vector.load %arg10[%c2, %c0_25] : memref<8x1152xf32, #tpu.memory_space<vmem>>, vector<1x144xf32>
    %c0_26 = arith.constant 0 : index
    %c288 = arith.constant 288 : index
    %25 = vector.load %arg11[%c0_26, %c288] : memref<8x896xf32, #tpu.memory_space<vmem>>, vector<1x144xf32>
    tpu.vector_store %arg11[%c0_26, %c288], %24 {strides = array<i32>} : memref<8x896xf32, #tpu.memory_space<vmem>>, vector<1x144xf32>,
    %c3 = arith.constant 3 : index
    %c0_27 = arith.constant 0 : index
    %26 = vector.load %arg10[%c3, %c0_27] : memref<8x1152xf32, #tpu.memory_space<vmem>>, vector<1x144xf32>
    %c0_28 = arith.constant 0 : index
    %c432 = arith.constant 432 : index
    %27 = vector.load %arg11[%c0_28, %c432] : memref<8x896xf32, #tpu.memory_space<vmem>>, vector<1x144xf32>
    tpu.vector_store %arg11[%c0_28, %c432], %26 {strides = array<i32>} : memref<8x896xf32, #tpu.memory_space<vmem>>, vector<1x144xf32>,
    %c4 = arith.constant 4 : index
    %c0_29 = arith.constant 0 : index
    %28 = vector.load %arg10[%c4, %c0_29] : memref<8x1152xf32, #tpu.memory_space<vmem>>, vector<1x144xf32>
    %c0_30 = arith.constant 0 : index
    %c576 = arith.constant 576 : index
    %29 = vector.load %arg11[%c0_30, %c576] : memref<8x896xf32, #tpu.memory_space<vmem>>, vector<1x144xf32>
    tpu.vector_store %arg11[%c0_30, %c576], %28 {strides = array<i32>} : memref<8x896xf32, #tpu.memory_space<vmem>>, vector<1x144xf32>,
    %c5 = arith.constant 5 : index
    %c0_31 = arith.constant 0 : index
    %30 = vector.load %arg10[%c5, %c0_31] : memref<8x1152xf32, #tpu.memory_space<vmem>>, vector<1x144xf32>
    %c0_32 = arith.constant 0 : index
    %c720 = arith.constant 720 : index
    %31 = vector.load %arg11[%c0_32, %c720] : memref<8x896xf32, #tpu.memory_space<vmem>>, vector<1x144xf32>
    tpu.vector_store %arg11[%c0_32, %c720], %30 {strides = array<i32>} : memref<8x896xf32, #tpu.memory_space<vmem>>, vector<1x144xf32>,
    %c0_33 = arith.constant 0 : index
    %c144_34 = arith.constant 144 : index
    %32 = vector.load %arg10[%c0_33, %c144_34] : memref<8x1152xf32, #tpu.memory_space<vmem>>, vector<1x144xf32>
    %c1_35 = arith.constant 1 : index
    %c0_36 = arith.constant 0 : index
    %33 = vector.load %arg11[%c1_35, %c0_36] : memref<8x896xf32, #tpu.memory_space<vmem>>, vector<1x144xf32>
    tpu.vector_store %arg11[%c1_35, %c0_36], %32 {strides = array<i32>} : memref<8x896xf32, #tpu.memory_space<vmem>>, vector<1x144xf32>,
    %c1_37 = arith.constant 1 : index
    %c144_38 = arith.constant 144 : index
    %34 = vector.load %arg10[%c1_37, %c144_38] : memref<8x1152xf32, #tpu.memory_space<vmem>>, vector<1x144xf32>
    %c1_39 = arith.constant 1 : index
    %c144_40 = arith.constant 144 : index
    %35 = vector.load %arg11[%c1_39, %c144_40] : memref<8x896xf32, #tpu.memory_space<vmem>>, vector<1x144xf32>
    tpu.vector_store %arg11[%c1_39, %c144_40], %34 {strides = array<i32>} : memref<8x896xf32, #tpu.memory_space<vmem>>, vector<1x144xf32>,
    %c2_41 = arith.constant 2 : index
    %c144_42 = arith.constant 144 : index
    %36 = vector.load %arg10[%c2_41, %c144_42] : memref<8x1152xf32, #tpu.memory_space<vmem>>, vector<1x144xf32>
    %c1_43 = arith.constant 1 : index
    %c288_44 = arith.constant 288 : index
    %37 = vector.load %arg11[%c1_43, %c288_44] : memref<8x896xf32, #tpu.memory_space<vmem>>, vector<1x144xf32>
    tpu.vector_store %arg11[%c1_43, %c288_44], %36 {strides = array<i32>} : memref<8x896xf32, #tpu.memory_space<vmem>>, vector<1x144xf32>,
    %c3_45 = arith.constant 3 : index
    %c144_46 = arith.constant 144 : index
    %38 = vector.load %arg10[%c3_45, %c144_46] : memref<8x1152xf32, #tpu.memory_space<vmem>>, vector<1x144xf32>
    %c1_47 = arith.constant 1 : index
    %c432_48 = arith.constant 432 : index
    %39 = vector.load %arg11[%c1_47, %c432_48] : memref<8x896xf32, #tpu.memory_space<vmem>>, vector<1x144xf32>
    tpu.vector_store %arg11[%c1_47, %c432_48], %38 {strides = array<i32>} : memref<8x896xf32, #tpu.memory_space<vmem>>, vector<1x144xf32>,
    %c4_49 = arith.constant 4 : index
    %c144_50 = arith.constant 144 : index
    %40 = vector.load %arg10[%c4_49, %c144_50] : memref<8x1152xf32, #tpu.memory_space<vmem>>, vector<1x144xf32>
    %c1_51 = arith.constant 1 : index
    %c576_52 = arith.constant 576 : index
    %41 = vector.load %arg11[%c1_51, %c576_52] : memref<8x896xf32, #tpu.memory_space<vmem>>, vector<1x144xf32>
    tpu.vector_store %arg11[%c1_51, %c576_52], %40 {strides = array<i32>} : memref<8x896xf32, #tpu.memory_space<vmem>>, vector<1x144xf32>,
    %c5_53 = arith.constant 5 : index
    %c144_54 = arith.constant 144 : index
    %42 = vector.load %arg10[%c5_53, %c144_54] : memref<8x1152xf32, #tpu.memory_space<vmem>>, vector<1x144xf32>
    %c1_55 = arith.constant 1 : index
    %c720_56 = arith.constant 720 : index
    %43 = vector.load %arg11[%c1_55, %c720_56] : memref<8x896xf32, #tpu.memory_space<vmem>>, vector<1x144xf32>
    tpu.vector_store %arg11[%c1_55, %c720_56], %42 {strides = array<i32>} : memref<8x896xf32, #tpu.memory_space<vmem>>, vector<1x144xf32>,
    %c0_57 = arith.constant 0 : index
    %c288_58 = arith.constant 288 : index
    %44 = vector.load %arg10[%c0_57, %c288_58] : memref<8x1152xf32, #tpu.memory_space<vmem>>, vector<1x144xf32>
    %c2_59 = arith.constant 2 : index
    %c0_60 = arith.constant 0 : index
    %45 = vector.load %arg11[%c2_59, %c0_60] : memref<8x896xf32, #tpu.memory_space<vmem>>, vector<1x144xf32>
    tpu.vector_store %arg11[%c2_59, %c0_60], %44 {strides = array<i32>} : memref<8x896xf32, #tpu.memory_space<vmem>>, vector<1x144xf32>,
    %c1_61 = arith.constant 1 : index
    %c288_62 = arith.constant 288 : index
    %46 = vector.load %arg10[%c1_61, %c288_62] : memref<8x1152xf32, #tpu.memory_space<vmem>>, vector<1x144xf32>
    %c2_63 = arith.constant 2 : index
    %c144_64 = arith.constant 144 : index
    %47 = vector.load %arg11[%c2_63, %c144_64] : memref<8x896xf32, #tpu.memory_space<vmem>>, vector<1x144xf32>
    tpu.vector_store %arg11[%c2_63, %c144_64], %46 {strides = array<i32>} : memref<8x896xf32, #tpu.memory_space<vmem>>, vector<1x144xf32>,
    %c2_65 = arith.constant 2 : index
    %c288_66 = arith.constant 288 : index
    %48 = vector.load %arg10[%c2_65, %c288_66] : memref<8x1152xf32, #tpu.memory_space<vmem>>, vector<1x144xf32>
    %c2_67 = arith.constant 2 : index
    %c288_68 = arith.constant 288 : index
    %49 = vector.load %arg11[%c2_67, %c288_68] : memref<8x896xf32, #tpu.memory_space<vmem>>, vector<1x144xf32>
    tpu.vector_store %arg11[%c2_67, %c288_68], %48 {strides = array<i32>} : memref<8x896xf32, #tpu.memory_space<vmem>>, vector<1x144xf32>,
    %c3_69 = arith.constant 3 : index
    %c288_70 = arith.constant 288 : index
    %50 = vector.load %arg10[%c3_69, %c288_70] : memref<8x1152xf32, #tpu.memory_space<vmem>>, vector<1x144xf32>
    %c2_71 = arith.constant 2 : index
    %c432_72 = arith.constant 432 : index
    %51 = vector.load %arg11[%c2_71, %c432_72] : memref<8x896xf32, #tpu.memory_space<vmem>>, vector<1x144xf32>
    tpu.vector_store %arg11[%c2_71, %c432_72], %50 {strides = array<i32>} : memref<8x896xf32, #tpu.memory_space<vmem>>, vector<1x144xf32>,
    %c4_73 = arith.constant 4 : index
    %c288_74 = arith.constant 288 : index
    %52 = vector.load %arg10[%c4_73, %c288_74] : memref<8x1152xf32, #tpu.memory_space<vmem>>, vector<1x144xf32>
    %c2_75 = arith.constant 2 : index
    %c576_76 = arith.constant 576 : index
    %53 = vector.load %arg11[%c2_75, %c576_76] : memref<8x896xf32, #tpu.memory_space<vmem>>, vector<1x144xf32>
    tpu.vector_store %arg11[%c2_75, %c576_76], %52 {strides = array<i32>} : memref<8x896xf32, #tpu.memory_space<vmem>>, vector<1x144xf32>,
    %c5_77 = arith.constant 5 : index
    %c288_78 = arith.constant 288 : index
    %54 = vector.load %arg10[%c5_77, %c288_78] : memref<8x1152xf32, #tpu.memory_space<vmem>>, vector<1x144xf32>
    %c2_79 = arith.constant 2 : index
    %c720_80 = arith.constant 720 : index
    %55 = vector.load %arg11[%c2_79, %c720_80] : memref<8x896xf32, #tpu.memory_space<vmem>>, vector<1x144xf32>
    tpu.vector_store %arg11[%c2_79, %c720_80], %54 {strides = array<i32>} : memref<8x896xf32, #tpu.memory_space<vmem>>, vector<1x144xf32>,
    %c0_81 = arith.constant 0 : index
    %c432_82 = arith.constant 432 : index
    %56 = vector.load %arg10[%c0_81, %c432_82] : memref<8x1152xf32, #tpu.memory_space<vmem>>, vector<1x144xf32>
    %c3_83 = arith.constant 3 : index
    %c0_84 = arith.constant 0 : index
    %57 = vector.load %arg11[%c3_83, %c0_84] : memref<8x896xf32, #tpu.memory_space<vmem>>, vector<1x144xf32>
    tpu.vector_store %arg11[%c3_83, %c0_84], %56 {strides = array<i32>} : memref<8x896xf32, #tpu.memory_space<vmem>>, vector<1x144xf32>,
    %c1_85 = arith.constant 1 : index
    %c432_86 = arith.constant 432 : index
    %58 = vector.load %arg10[%c1_85, %c432_86] : memref<8x1152xf32, #tpu.memory_space<vmem>>, vector<1x144xf32>
    %c3_87 = arith.constant 3 : index
    %c144_88 = arith.constant 144 : index
    %59 = vector.load %arg11[%c3_87, %c144_88] : memref<8x896xf32, #tpu.memory_space<vmem>>, vector<1x144xf32>
    tpu.vector_store %arg11[%c3_87, %c144_88], %58 {strides = array<i32>} : memref<8x896xf32, #tpu.memory_space<vmem>>, vector<1x144xf32>,
    %c2_89 = arith.constant 2 : index
    %c432_90 = arith.constant 432 : index
    %60 = vector.load %arg10[%c2_89, %c432_90] : memref<8x1152xf32, #tpu.memory_space<vmem>>, vector<1x144xf32>
    %c3_91 = arith.constant 3 : index
    %c288_92 = arith.constant 288 : index
    %61 = vector.load %arg11[%c3_91, %c288_92] : memref<8x896xf32, #tpu.memory_space<vmem>>, vector<1x144xf32>
    tpu.vector_store %arg11[%c3_91, %c288_92], %60 {strides = array<i32>} : memref<8x896xf32, #tpu.memory_space<vmem>>, vector<1x144xf32>,
    %c3_93 = arith.constant 3 : index
    %c432_94 = arith.constant 432 : index
    %62 = vector.load %arg10[%c3_93, %c432_94] : memref<8x1152xf32, #tpu.memory_space<vmem>>, vector<1x144xf32>
    %c3_95 = arith.constant 3 : index
    %c432_96 = arith.constant 432 : index
    %63 = vector.load %arg11[%c3_95, %c432_96] : memref<8x896xf32, #tpu.memory_space<vmem>>, vector<1x144xf32>
    tpu.vector_store %arg11[%c3_95, %c432_96], %62 {strides = array<i32>} : memref<8x896xf32, #tpu.memory_space<vmem>>, vector<1x144xf32>,
    %c4_97 = arith.constant 4 : index
    %c432_98 = arith.constant 432 : index
    %64 = vector.load %arg10[%c4_97, %c432_98] : memref<8x1152xf32, #tpu.memory_space<vmem>>, vector<1x144xf32>
    %c3_99 = arith.constant 3 : index
    %c576_100 = arith.constant 576 : index
    %65 = vector.load %arg11[%c3_99, %c576_100] : memref<8x896xf32, #tpu.memory_space<vmem>>, vector<1x144xf32>
    tpu.vector_store %arg11[%c3_99, %c576_100], %64 {strides = array<i32>} : memref<8x896xf32, #tpu.memory_space<vmem>>, vector<1x144xf32>,
    %c5_101 = arith.constant 5 : index
    %c432_102 = arith.constant 432 : index
    %66 = vector.load %arg10[%c5_101, %c432_102] : memref<8x1152xf32, #tpu.memory_space<vmem>>, vector<1x144xf32>
    %c3_103 = arith.constant 3 : index
    %c720_104 = arith.constant 720 : index
    %67 = vector.load %arg11[%c3_103, %c720_104] : memref<8x896xf32, #tpu.memory_space<vmem>>, vector<1x144xf32>
    tpu.vector_store %arg11[%c3_103, %c720_104], %66 {strides = array<i32>} : memref<8x896xf32, #tpu.memory_space<vmem>>, vector<1x144xf32>,
    %c0_105 = arith.constant 0 : index
    %c576_106 = arith.constant 576 : index
    %68 = vector.load %arg10[%c0_105, %c576_106] : memref<8x1152xf32, #tpu.memory_space<vmem>>, vector<1x144xf32>
    %c4_107 = arith.constant 4 : index
    %c0_108 = arith.constant 0 : index
    %69 = vector.load %arg11[%c4_107, %c0_108] : memref<8x896xf32, #tpu.memory_space<vmem>>, vector<1x144xf32>
    tpu.vector_store %arg11[%c4_107, %c0_108], %68 {strides = array<i32>} : memref<8x896xf32, #tpu.memory_space<vmem>>, vector<1x144xf32>,
    %c1_109 = arith.constant 1 : index
    %c576_110 = arith.constant 576 : index
    %70 = vector.load %arg10[%c1_109, %c576_110] : memref<8x1152xf32, #tpu.memory_space<vmem>>, vector<1x144xf32>
    %c4_111 = arith.constant 4 : index
    %c144_112 = arith.constant 144 : index
    %71 = vector.load %arg11[%c4_111, %c144_112] : memref<8x896xf32, #tpu.memory_space<vmem>>, vector<1x144xf32>
    tpu.vector_store %arg11[%c4_111, %c144_112], %70 {strides = array<i32>} : memref<8x896xf32, #tpu.memory_space<vmem>>, vector<1x144xf32>,
    %c2_113 = arith.constant 2 : index
    %c576_114 = arith.constant 576 : index
    %72 = vector.load %arg10[%c2_113, %c576_114] : memref<8x1152xf32, #tpu.memory_space<vmem>>, vector<1x144xf32>
    %c4_115 = arith.constant 4 : index
    %c288_116 = arith.constant 288 : index
    %73 = vector.load %arg11[%c4_115, %c288_116] : memref<8x896xf32, #tpu.memory_space<vmem>>, vector<1x144xf32>
    tpu.vector_store %arg11[%c4_115, %c288_116], %72 {strides = array<i32>} : memref<8x896xf32, #tpu.memory_space<vmem>>, vector<1x144xf32>,
    %c3_117 = arith.constant 3 : index
    %c576_118 = arith.constant 576 : index
    %74 = vector.load %arg10[%c3_117, %c576_118] : memref<8x1152xf32, #tpu.memory_space<vmem>>, vector<1x144xf32>
    %c4_119 = arith.constant 4 : index
    %c432_120 = arith.constant 432 : index
    %75 = vector.load %arg11[%c4_119, %c432_120] : memref<8x896xf32, #tpu.memory_space<vmem>>, vector<1x144xf32>
    tpu.vector_store %arg11[%c4_119, %c432_120], %74 {strides = array<i32>} : memref<8x896xf32, #tpu.memory_space<vmem>>, vector<1x144xf32>,
    %c4_121 = arith.constant 4 : index
    %c576_122 = arith.constant 576 : index
    %76 = vector.load %arg10[%c4_121, %c576_122] : memref<8x1152xf32, #tpu.memory_space<vmem>>, vector<1x144xf32>
    %c4_123 = arith.constant 4 : index
    %c576_124 = arith.constant 576 : index
    %77 = vector.load %arg11[%c4_123, %c576_124] : memref<8x896xf32, #tpu.memory_space<vmem>>, vector<1x144xf32>
    tpu.vector_store %arg11[%c4_123, %c576_124], %76 {strides = array<i32>} : memref<8x896xf32, #tpu.memory_space<vmem>>, vector<1x144xf32>,
    %c5_125 = arith.constant 5 : index
    %c576_126 = arith.constant 576 : index
    %78 = vector.load %arg10[%c5_125, %c576_126] : memref<8x1152xf32, #tpu.memory_space<vmem>>, vector<1x144xf32>
    %c4_127 = arith.constant 4 : index
    %c720_128 = arith.constant 720 : index
    %79 = vector.load %arg11[%c4_127, %c720_128] : memref<8x896xf32, #tpu.memory_space<vmem>>, vector<1x144xf32>
    tpu.vector_store %arg11[%c4_127, %c720_128], %78 {strides = array<i32>} : memref<8x896xf32, #tpu.memory_space<vmem>>, vector<1x144xf32>,
    %c0_129 = arith.constant 0 : index
    %c720_130 = arith.constant 720 : index
    %80 = vector.load %arg10[%c0_129, %c720_130] : memref<8x1152xf32, #tpu.memory_space<vmem>>, vector<1x144xf32>
    %c5_131 = arith.constant 5 : index
    %c0_132 = arith.constant 0 : index
    %81 = vector.load %arg11[%c5_131, %c0_132] : memref<8x896xf32, #tpu.memory_space<vmem>>, vector<1x144xf32>
    tpu.vector_store %arg11[%c5_131, %c0_132], %80 {strides = array<i32>} : memref<8x896xf32, #tpu.memory_space<vmem>>, vector<1x144xf32>,
    %c1_133 = arith.constant 1 : index
    %c720_134 = arith.constant 720 : index
    %82 = vector.load %arg10[%c1_133, %c720_134] : memref<8x1152xf32, #tpu.memory_space<vmem>>, vector<1x144xf32>
    %c5_135 = arith.constant 5 : index
    %c144_136 = arith.constant 144 : index
    %83 = vector.load %arg11[%c5_135, %c144_136] : memref<8x896xf32, #tpu.memory_space<vmem>>, vector<1x144xf32>
    tpu.vector_store %arg11[%c5_135, %c144_136], %82 {strides = array<i32>} : memref<8x896xf32, #tpu.memory_space<vmem>>, vector<1x144xf32>,
    %c2_137 = arith.constant 2 : index
    %c720_138 = arith.constant 720 : index
    %84 = vector.load %arg10[%c2_137, %c720_138] : memref<8x1152xf32, #tpu.memory_space<vmem>>, vector<1x144xf32>
    %c5_139 = arith.constant 5 : index
    %c288_140 = arith.constant 288 : index
    %85 = vector.load %arg11[%c5_139, %c288_140] : memref<8x896xf32, #tpu.memory_space<vmem>>, vector<1x144xf32>
    tpu.vector_store %arg11[%c5_139, %c288_140], %84 {strides = array<i32>} : memref<8x896xf32, #tpu.memory_space<vmem>>, vector<1x144xf32>,
    %c3_141 = arith.constant 3 : index
    %c720_142 = arith.constant 720 : index
    %86 = vector.load %arg10[%c3_141, %c720_142] : memref<8x1152xf32, #tpu.memory_space<vmem>>, vector<1x144xf32>
    %c5_143 = arith.constant 5 : index
    %c432_144 = arith.constant 432 : index
    %87 = vector.load %arg11[%c5_143, %c432_144] : memref<8x896xf32, #tpu.memory_space<vmem>>, vector<1x144xf32>
    tpu.vector_store %arg11[%c5_143, %c432_144], %86 {strides = array<i32>} : memref<8x896xf32, #tpu.memory_space<vmem>>, vector<1x144xf32>,
    %c4_145 = arith.constant 4 : index
    %c720_146 = arith.constant 720 : index
    %88 = vector.load %arg10[%c4_145, %c720_146] : memref<8x1152xf32, #tpu.memory_space<vmem>>, vector<1x144xf32>
    %c5_147 = arith.constant 5 : index
    %c576_148 = arith.constant 576 : index
    %89 = vector.load %arg11[%c5_147, %c576_148] : memref<8x896xf32, #tpu.memory_space<vmem>>, vector<1x144xf32>
    tpu.vector_store %arg11[%c5_147, %c576_148], %88 {strides = array<i32>} : memref<8x896xf32, #tpu.memory_space<vmem>>, vector<1x144xf32>,
    %c5_149 = arith.constant 5 : index
    %c720_150 = arith.constant 720 : index
    %90 = vector.load %arg10[%c5_149, %c720_150] : memref<8x1152xf32, #tpu.memory_space<vmem>>, vector<1x144xf32>
    %c5_151 = arith.constant 5 : index
    %c720_152 = arith.constant 720 : index
    %91 = vector.load %arg11[%c5_151, %c720_152] : memref<8x896xf32, #tpu.memory_space<vmem>>, vector<1x144xf32>
    tpu.vector_store %arg11[%c5_151, %c720_152], %90 {strides = array<i32>} : memref<8x896xf32, #tpu.memory_space<vmem>>, vector<1x144xf32>,
    %c0_153 = arith.constant 0 : index
    %c864 = arith.constant 864 : index
    %92 = vector.load %arg10[%c0_153, %c864] : memref<8x1152xf32, #tpu.memory_space<vmem>>, vector<1x144xf32>
    %c6 = arith.constant 6 : index
    %c0_154 = arith.constant 0 : index
    %93 = vector.load %arg11[%c6, %c0_154] : memref<8x896xf32, #tpu.memory_space<vmem>>, vector<1x144xf32>
    tpu.vector_store %arg11[%c6, %c0_154], %92 {strides = array<i32>} : memref<8x896xf32, #tpu.memory_space<vmem>>, vector<1x144xf32>,
    %c1_155 = arith.constant 1 : index
    %c864_156 = arith.constant 864 : index
    %94 = vector.load %arg10[%c1_155, %c864_156] : memref<8x1152xf32, #tpu.memory_space<vmem>>, vector<1x144xf32>
    %c6_157 = arith.constant 6 : index
    %c144_158 = arith.constant 144 : index
    %95 = vector.load %arg11[%c6_157, %c144_158] : memref<8x896xf32, #tpu.memory_space<vmem>>, vector<1x144xf32>
    tpu.vector_store %arg11[%c6_157, %c144_158], %94 {strides = array<i32>} : memref<8x896xf32, #tpu.memory_space<vmem>>, vector<1x144xf32>,
    %c2_159 = arith.constant 2 : index
    %c864_160 = arith.constant 864 : index
    %96 = vector.load %arg10[%c2_159, %c864_160] : memref<8x1152xf32, #tpu.memory_space<vmem>>, vector<1x144xf32>
    %c6_161 = arith.constant 6 : index
    %c288_162 = arith.constant 288 : index
    %97 = vector.load %arg11[%c6_161, %c288_162] : memref<8x896xf32, #tpu.memory_space<vmem>>, vector<1x144xf32>
    tpu.vector_store %arg11[%c6_161, %c288_162], %96 {strides = array<i32>} : memref<8x896xf32, #tpu.memory_space<vmem>>, vector<1x144xf32>,
    %c3_163 = arith.constant 3 : index
    %c864_164 = arith.constant 864 : index
    %98 = vector.load %arg10[%c3_163, %c864_164] : memref<8x1152xf32, #tpu.memory_space<vmem>>, vector<1x144xf32>
    %c6_165 = arith.constant 6 : index
    %c432_166 = arith.constant 432 : index
    %99 = vector.load %arg11[%c6_165, %c432_166] : memref<8x896xf32, #tpu.memory_space<vmem>>, vector<1x144xf32>
    tpu.vector_store %arg11[%c6_165, %c432_166], %98 {strides = array<i32>} : memref<8x896xf32, #tpu.memory_space<vmem>>, vector<1x144xf32>,
    %c4_167 = arith.constant 4 : index
    %c864_168 = arith.constant 864 : index
    %100 = vector.load %arg10[%c4_167, %c864_168] : memref<8x1152xf32, #tpu.memory_space<vmem>>, vector<1x144xf32>
    %c6_169 = arith.constant 6 : index
    %c576_170 = arith.constant 576 : index
    %101 = vector.load %arg11[%c6_169, %c576_170] : memref<8x896xf32, #tpu.memory_space<vmem>>, vector<1x144xf32>
    tpu.vector_store %arg11[%c6_169, %c576_170], %100 {strides = array<i32>} : memref<8x896xf32, #tpu.memory_space<vmem>>, vector<1x144xf32>,
    %c5_171 = arith.constant 5 : index
    %c864_172 = arith.constant 864 : index
    %102 = vector.load %arg10[%c5_171, %c864_172] : memref<8x1152xf32, #tpu.memory_space<vmem>>, vector<1x144xf32>
    %c6_173 = arith.constant 6 : index
    %c720_174 = arith.constant 720 : index
    %103 = vector.load %arg11[%c6_173, %c720_174] : memref<8x896xf32, #tpu.memory_space<vmem>>, vector<1x144xf32>
    tpu.vector_store %arg11[%c6_173, %c720_174], %102 {strides = array<i32>} : memref<8x896xf32, #tpu.memory_space<vmem>>, vector<1x144xf32>,
    %c0_175 = arith.constant 0 : index
    %c1008 = arith.constant 1008 : index
    %104 = vector.load %arg10[%c0_175, %c1008] : memref<8x1152xf32, #tpu.memory_space<vmem>>, vector<1x144xf32>
    %c7 = arith.constant 7 : index
    %c0_176 = arith.constant 0 : index
    %105 = vector.load %arg11[%c7, %c0_176] : memref<8x896xf32, #tpu.memory_space<vmem>>, vector<1x144xf32>
    tpu.vector_store %arg11[%c7, %c0_176], %104 {strides = array<i32>} : memref<8x896xf32, #tpu.memory_space<vmem>>, vector<1x144xf32>,
    %c1_177 = arith.constant 1 : index
    %c1008_178 = arith.constant 1008 : index
    %106 = vector.load %arg10[%c1_177, %c1008_178] : memref<8x1152xf32, #tpu.memory_space<vmem>>, vector<1x144xf32>
    %c7_179 = arith.constant 7 : index
    %c144_180 = arith.constant 144 : index
    %107 = vector.load %arg11[%c7_179, %c144_180] : memref<8x896xf32, #tpu.memory_space<vmem>>, vector<1x144xf32>
    tpu.vector_store %arg11[%c7_179, %c144_180], %106 {strides = array<i32>} : memref<8x896xf32, #tpu.memory_space<vmem>>, vector<1x144xf32>,
    %c2_181 = arith.constant 2 : index
    %c1008_182 = arith.constant 1008 : index
    %108 = vector.load %arg10[%c2_181, %c1008_182] : memref<8x1152xf32, #tpu.memory_space<vmem>>, vector<1x144xf32>
    %c7_183 = arith.constant 7 : index
    %c288_184 = arith.constant 288 : index
    %109 = vector.load %arg11[%c7_183, %c288_184] : memref<8x896xf32, #tpu.memory_space<vmem>>, vector<1x144xf32>
    tpu.vector_store %arg11[%c7_183, %c288_184], %108 {strides = array<i32>} : memref<8x896xf32, #tpu.memory_space<vmem>>, vector<1x144xf32>,
    %c3_185 = arith.constant 3 : index
    %c1008_186 = arith.constant 1008 : index
    %110 = vector.load %arg10[%c3_185, %c1008_186] : memref<8x1152xf32, #tpu.memory_space<vmem>>, vector<1x144xf32>
    %c7_187 = arith.constant 7 : index
    %c432_188 = arith.constant 432 : index
    %111 = vector.load %arg11[%c7_187, %c432_188] : memref<8x896xf32, #tpu.memory_space<vmem>>, vector<1x144xf32>
    tpu.vector_store %arg11[%c7_187, %c432_188], %110 {strides = array<i32>} : memref<8x896xf32, #tpu.memory_space<vmem>>, vector<1x144xf32>,
    %c4_189 = arith.constant 4 : index
    %c1008_190 = arith.constant 1008 : index
    %112 = vector.load %arg10[%c4_189, %c1008_190] : memref<8x1152xf32, #tpu.memory_space<vmem>>, vector<1x144xf32>
    %c7_191 = arith.constant 7 : index
    %c576_192 = arith.constant 576 : index
    %113 = vector.load %arg11[%c7_191, %c576_192] : memref<8x896xf32, #tpu.memory_space<vmem>>, vector<1x144xf32>
    tpu.vector_store %arg11[%c7_191, %c576_192], %112 {strides = array<i32>} : memref<8x896xf32, #tpu.memory_space<vmem>>, vector<1x144xf32>,
    %c5_193 = arith.constant 5 : index
    %c1008_194 = arith.constant 1008 : index
    %114 = vector.load %arg10[%c5_193, %c1008_194] : memref<8x1152xf32, #tpu.memory_space<vmem>>, vector<1x144xf32>
    %c7_195 = arith.constant 7 : index
    %c720_196 = arith.constant 720 : index
    %115 = vector.load %arg11[%c7_195, %c720_196] : memref<8x896xf32, #tpu.memory_space<vmem>>, vector<1x144xf32>
    tpu.vector_store %arg11[%c7_195, %c720_196], %114 {strides = array<i32>} : memref<8x896xf32, #tpu.memory_space<vmem>>, vector<1x144xf32>,
    %c0_197 = arith.constant 0 : index
    %c0_198 = arith.constant 0 : index
    %116 = vector.load %arg11[%c0_197, %c0_198] : memref<8x896xf32, #tpu.memory_space<vmem>>, vector<8x896xf32>
    %c0_199 = arith.constant 0 : index
    %c0_200 = arith.constant 0 : index
    %117 = vector.load %arg4[%c0_199, %c0_200] : memref<896x256xf32, #tpu.memory_space<vmem>>, vector<896x256xf32>
    %cst_201 = arith.constant dense<0.000000e+00> : vector<8x256xf32>
    %118 = tpu.matmul %116, %117, %cst_201 {dimension_numbers = #tpu.dot_dimension_numbers<[1], [0], [0], [1], [0, 0, 1, 1], [], []>} : vector<8x896xf32>, vector<896x256xf32>, vector<8x256xf32> -> vector<8x256xf32>
    %c0_202 = arith.constant 0 : index
    %c0_203 = arith.constant 0 : index
    %119 = vector.load %arg5[%c0_202, %c0_203] : memref<1x256xf32, #tpu.memory_space<vmem>>, vector<1x256xf32>
    %120 = vector.broadcast %119 : vector<1x256xf32> to vector<8x256xf32>
    %121 = arith.addf %118, %120 : vector<8x256xf32>
    %cst_204 = arith.constant 0.000000e+00 : f32
    %122 = vector.broadcast %cst_204 : f32 to vector<8x256xf32>
    %123 = arith.maximumf %121, %122 : vector<8x256xf32>
    %c0_205 = arith.constant 0 : index
    %c0_206 = arith.constant 0 : index
    %124 = vector.load %arg6[%c0_205, %c0_206] : memref<256x128xf32, #tpu.memory_space<vmem>>, vector<256x128xf32>
    %cst_207 = arith.constant dense<0.000000e+00> : vector<8x128xf32>
    %125 = tpu.matmul %123, %124, %cst_207 {dimension_numbers = #tpu.dot_dimension_numbers<[1], [0], [0], [1], [0, 0, 1, 1], [], []>} : vector<8x256xf32>, vector<256x128xf32>, vector<8x128xf32> -> vector<8x128xf32>
    %c0_208 = arith.constant 0 : index
    %c0_209 = arith.constant 0 : index
    %126 = vector.load %arg7[%c0_208, %c0_209] : memref<1x128xf32, #tpu.memory_space<vmem>>, vector<1x128xf32>
    %127 = vector.broadcast %126 : vector<1x128xf32> to vector<8x128xf32>
    %128 = arith.addf %125, %127 : vector<8x128xf32>
    %c0_210 = arith.constant 0 : index
    %c0_211 = arith.constant 0 : index
    %129 = vector.load %arg8[%c0_210, %c0_211] : memref<8x128xf32, #tpu.memory_space<vmem>>, vector<8x128xf32>
    tpu.vector_store %arg8[%c0_210, %c0_211], %128 {strides = array<i32>} : memref<8x128xf32, #tpu.memory_space<vmem>>, vector<8x128xf32>,
    return
  }
  func.func @transform_0(%arg0: i32) -> (i32, i32, i32) {
    %c0_i32 = arith.constant 0 : i32
    %c0_i32_0 = arith.constant 0 : i32
    %c0_i32_1 = arith.constant 0 : i32
    return %arg0, %c0_i32, %c0_i32_0 : i32, i32, i32
  }
  func.func @transform_1(%arg0: i32) -> (i32, i32) {
    %c0_i32 = arith.constant 0 : i32
    %c0_i32_0 = arith.constant 0 : i32
    %c0_i32_1 = arith.constant 0 : i32
    return %c0_i32, %c0_i32_0 : i32, i32
  }
  func.func @transform_2(%arg0: i32) -> (i32, i32) {
    %c0_i32 = arith.constant 0 : i32
    %c0_i32_0 = arith.constant 0 : i32
    %c0_i32_1 = arith.constant 0 : i32
    return %c0_i32, %c0_i32_0 : i32, i32
  }
  func.func @transform_3(%arg0: i32) -> (i32, i32) {
    %c0_i32 = arith.constant 0 : i32
    %c0_i32_0 = arith.constant 0 : i32
    %c0_i32_1 = arith.constant 0 : i32
    return %c0_i32, %c0_i32_0 : i32, i32
  }
  func.func @transform_4(%arg0: i32) -> (i32, i32) {
    %c0_i32 = arith.constant 0 : i32
    %c0_i32_0 = arith.constant 0 : i32
    %c0_i32_1 = arith.constant 0 : i32
    return %c0_i32, %c0_i32_0 : i32, i32
  }
  func.func @transform_5(%arg0: i32) -> (i32, i32) {
    %c0_i32 = arith.constant 0 : i32
    %c0_i32_0 = arith.constant 0 : i32
    %c0_i32_1 = arith.constant 0 : i32
    return %c0_i32, %c0_i32_0 : i32, i32
  }
  func.func @transform_6(%arg0: i32) -> (i32, i32) {
    %c0_i32 = arith.constant 0 : i32
    %c0_i32_0 = arith.constant 0 : i32
    %c0_i32_1 = arith.constant 0 : i32
    return %c0_i32, %c0_i32_0 : i32, i32
  }
  func.func @transform_7(%arg0: i32) -> (i32, i32) {
    %c0_i32 = arith.constant 0 : i32
    %c0_i32_0 = arith.constant 0 : i32
    return %arg0, %c0_i32 : i32, i32
  }
}

</mosaic_0001>

<bundles_post_ra>
// kernel: _lambda_.1
= control target key start
LH: loop header
LB: loop body
LE: loop exit
PB: predicated region body
PF: predicated region fallthrough
CT: control target
= control target key end

     0   :  { %12 = vsyncpa [#allocation6], 0  ;;  %s4663_s0 = inlined_call_operand.vmem [shape: f32[2,32,4608], index: 0, kind: input, shape index: {}]   ;;  %s4664_s1 = inlined_call_operand.vmem [shape: f32[8,32], index: 1, kind: input, shape index: {}]   ;;  %s4665_s2 = inlined_call_operand.vmem [shape: f32[8,1], index: 2, kind: input, shape index: {}]   ;;  %s4666_s3 = inlined_call_operand.vmem [shape: f32[896,256], index: 3, kind: input, shape index: {}]   ;;  %s4667_s4 = inlined_call_operand.vmem [shape: f32[1,256], index: 4, kind: input, shape index: {}]   ;;  %s4668_s5 = inlined_call_operand.vmem [shape: f32[256,128], index: 5, kind: input, shape index: {}]   ;;  %s4669_s6 = inlined_call_operand.vmem [shape: f32[1,128], index: 6, kind: input, shape index: {}]   ;;  %s4670_s7 = inlined_call_operand.hbm [shape: f32[16,128], index: 7, kind: output, shape index: {}]  }
   0x1   :  { %14 = vsyncpa [#allocation6 + $0x1], 0  ;;  %s3296_s24 = smov 0   ;;  %s3298_s25 = smov 0  }
   0x2   :  { %s3300_s26 = smov 0   ;;  %s3302_s27 = smov 0  }
   0x3 LB: > { %s3317_s28 = sadd.s32 4294967295, %s3244_s27   ;;  %s3070_s29 = sadd.s32 4294967294, %s3244_s27   ;;  %s3244_s27 = sphi %s3302_s27, %s4703_s27   ;;  %s3240_s26 = sphi %s3300_s26, %s4702_s26   ;;  %s3236_s25 = sphi %s3298_s25, %s4701_s25   ;;  %s3232_s24 = sphi %s3296_s24, %s4700_s24  }
   0x4   : > { %s3321_s30 = sadd.s32 1, %s3244_s27   ;;  %s179_s8 = sadd.s32 1, %s3240_s26 }
   0x5   : > { %s176_s9 = ssub.s32 %s3244_s27, %s3321_s30  ;;  %p189_p0 = scmp.ne.s32.totalorder %s3240_s26, %s3236_s25 }
   0x6   : > { %p177_p1 = scmp.eq.s32.totalorder %s176_s9, 0  ;;  %p190_p2 = scmp.eq.s32.totalorder %s3317_s28, 1 }
   0x7   : > { %p195_p3 = scmp.ne.s32.totalorder %s3236_s25, %s3232_s24  ;;  %p196_p4 = scmp.eq.s32.totalorder %s3070_s29, 1 }
   0x8   : > { %s3332_s10 = scalar_select %p177_p1, %s3240_s26, %s179_s8  }
   0x9   : > { %p3334_p5 = por %p190_p2, %p189_p0  ;;  %p3338_p6 = por %p196_p4, %p195_p3 }
   0xa   : > { %p3073_p7 = scmp.ge.s32.totalorder %s3244_s27, 1  ;;  %p240_p8 = scmp.lt.s32.totalorder %s3244_s27, 3 }
   0xc   : > { %p241_p9 = pnand %p3073_p7, %p240_p8 }
   0xd   : > { %p272_p10 = scmp.lt.s32.totalorder (!%p241_p9), %s3317_s28, 1  ;;  %s3248_s14 = smov (!%p241_p9), 16  }
   0xe   : > { %244 = sbr.rel (%p241_p9) target bundleno = 944 (0x3b0), region = 48  ;;  %s4679_s17 = smov (!%p241_p9), 96  }
   0xf   : > { %s4675_s20 = smov (!%p241_p9), 112   ;;  %s4671_s21 = smov (!%p241_p9), 80  }
  0x10   : > { %s4673_s22 = smov (!%p241_p9), 64   ;;  %s4677_s23 = smov (!%p241_p9), 32  }
  0x11   : > { %s3254_s29 = smov (!%p241_p9), 48   ;;  %s4686_s8 = smov (!%p241_p9), 64  }
  0x12   : > { %s4687_s18 = smov (!%p241_p9), 80   ;;  %s4688_s9 = smov (!%p241_p9), 32  }
  0x13   : > { %v1803_v0 = vld [vmem:[%s4665_s2] sm:$0xff]  ;;  %v3246_v1 = vmov 0.0   ;;  %s273_s15 = scalar_select %p272_p10, %s3317_s28, 1  ;;  %v3247_v2 = vmov 0   ;;  %vm422_vm0 = vcmask 261120   ;;  %vm1856_vm4 = vcmask 130048  }
  0x14   : > { %490 = vmatprep.mubr.f32.mxu0 %v3246_v1  ;;  %1836 = vst [vmem:[#allocation4] sm:$0xff] %v3246_v1  ;;  %1837 = vst [vmem:[#allocation4 + $0x8] sm:$0xff] %v3246_v1  ;;  %561 = vmatprep.mubr.f32.mxu1 %v3246_v1  ;;  %v3382_v19 = vld [vmem:[%s4664_s1] sm:$0xff]  ;;  %vm1991_vm6 = vcmask 785408   ;;  %vm1930_vm7 = vcmask 916480   ;;  %vm1915_vm8 = vcmask 654336  }
  0x15   : > { %1838 = vst [vmem:[#allocation4 + $0x10] sm:$0xff] %v3246_v1  ;;  %1839 = vst [vmem:[#allocation4 + $0x18] sm:$0xff] %v3246_v1  ;;  %3183 = vset.pattern.permute.xlu0 %v3247_v2  ;;  %s3134_s16 = smul.u32 1152, %s273_s15  ;;  %vm1900_vm11 = vcmask 523264   ;;  %vm1885_vm13 = vcmask 392192   ;;  %s269_s13 = sand.u32 1, %s3236_s25  }
  0x16   : > { %1840 = vst [vmem:[#allocation4 + $0x20] sm:$0xff] %v3246_v1  ;;  %1841 = vst [vmem:[#allocation4 + $0x28] sm:$0xff] %v3246_v1  ;;  %1806 = vperm.xlu0 %3183, %v1803_v0  }
  0x17   : > { %1842 = vst [vmem:[#allocation4 + $0x30] sm:$0xff] %v3246_v1  ;;  %s3361_s19 = scalar_lea.vmem %s4663_s0, %s3134_s16 }
  0x18   : > { %v387_v3 = vld [vmem:[%s3361_s19 + $0x368] sm:$0xff]  ;;  %v389_v4 = vld [vmem:[%s3361_s19 + $0x378] sm:$0xff]  ;;  %v386_v5 = vld [vmem:[%s3361_s19 + $0x360] sm:$0xff] }
  0x19   : > { %450 = vmatprep.subr.mxu0 %v387_v3  ;;  %521 = vmatprep.subr.mxu1 %v389_v4  ;;  %v388_v6 = vld [vmem:[%s3361_s19 + $0x370] sm:$0xff]  ;;  %v351_v7 = vld [vmem:[%s3361_s19 + $0x248] sm:$0xff]  ;;  %v353_v8 = vld [vmem:[%s3361_s19 + $0x258] sm:$0xff] }
  0x1a   : > { %451 = vmatpush1.msra.mxu0 %v386_v5  ;;  %522 = vmatpush1.msra.mxu1 %v388_v6  ;;  %v350_v9 = vld [vmem:[%s3361_s19 + $0x240] sm:$0xff]  ;;  %v352_v10 = vld [vmem:[%s3361_s19 + $0x250] sm:$0xff]  ;;  %v315_v11 = vld [vmem:[%s3361_s19 + $0x128] sm:$0xff] }
  0x1b   : > { %452 = vmatprep.subr.mxu0 %v351_v7  ;;  %523 = vmatprep.subr.mxu1 %v353_v8  ;;  %v317_v12 = vld [vmem:[%s3361_s19 + $0x138] sm:$0xff]  ;;  %v314_v13 = vld [vmem:[%s3361_s19 + $0x120] sm:$0xff]  ;;  %v316_v14 = vld [vmem:[%s3361_s19 + $0x130] sm:$0xff] }
  0x1c   : > { %453 = vmatpush1.msra.mxu0 %v350_v9  ;;  %524 = vmatpush1.msra.mxu1 %v352_v10  ;;  %v279_v15 = vld [vmem:[%s3361_s19 + $0x8] sm:$0xff]  ;;  %v281_v16 = vld [vmem:[%s3361_s19 + $0x18] sm:$0xff]  ;;  %v278_v17 = vld [vmem:[%s3361_s19] sm:$0xff] }
  0x1d   : > { %454 = vmatprep.subr.mxu0 %v315_v11  ;;  %525 = vmatprep.subr.mxu1 %v317_v12  ;;  %v280_v18 = vld [vmem:[%s3361_s19 + $0x10] sm:$0xff]  ;;  %v391_v20 = vld [vmem:[%s3361_s19 + $0x388] sm:$0xff]  ;;  %v393_v21 = vld [vmem:[%s3361_s19 + $0x398] sm:$0xff] }
  0x1e   : > { %455 = vmatpush1.msra.mxu0 %v314_v13  ;;  %526 = vmatpush1.msra.mxu1 %v316_v14  ;;  %v390_v22 = vld [vmem:[%s3361_s19 + $0x380] sm:$0xff]  ;;  %v392_v23 = vld [vmem:[%s3361_s19 + $0x390] sm:$0xff]  ;;  %v355_v24 = vld [vmem:[%s3361_s19 + $0x268] sm:$0xff] }
  0x1f   : > { %456 = vmatprep.subr.mxu0 %v279_v15  ;;  %527 = vmatprep.subr.mxu1 %v281_v16  ;;  %v357_v25 = vld [vmem:[%s3361_s19 + $0x278] sm:$0xff]  ;;  %v354_v26 = vld [vmem:[%s3361_s19 + $0x260] sm:$0xff]  ;;  %v356_v27 = vld [vmem:[%s3361_s19 + $0x270] sm:$0xff] }
  0x20   : > { %457 = vmatpush1.msra.mxu0 %v278_v17  ;;  %528 = vmatpush1.msra.mxu1 %v280_v18  ;;  %v319_v28 = vld [vmem:[%s3361_s19 + $0x148] sm:$0xff]  ;;  %v321_v29 = vld [vmem:[%s3361_s19 + $0x158] sm:$0xff]  ;;  %v318_v30 = vld [vmem:[%s3361_s19 + $0x140] sm:$0xff] }
  0x21   : > { %3076 = vmatmul.mubr.msk.f32.vlgmr.msra.gmra.mxu0 %vm422_vm0, %v3382_v19  ;;  %592 = vmatprep.subr.mxu0 %v391_v20  ;;  %v320_v31 = vld [vmem:[%s3361_s19 + $0x150] sm:$0xff]  ;;  %v283_v32 = vld [vmem:[%s3361_s19 + $0x28] sm:$0xff]  ;;  %v285_v33 = vld [vmem:[%s3361_s19 + $0x38] sm:$0xff] }
  0x22   : > { %663 = vmatprep.subr.mxu1 %v393_v21  ;;  %3077 = vmatmul.mubr.msk.f32.vlgmr.msra.gmra.mxu1 %vm422_vm0, %v3382_v19  ;;  %v282_v34 = vld [vmem:[%s3361_s19 + $0x20] sm:$0xff]  ;;  %v284_v35 = vld [vmem:[%s3361_s19 + $0x30] sm:$0xff]  ;;  %v395_v36 = vld [vmem:[%s3361_s19 + $0x3a8] sm:$0xff] }
  0x23   : > { %593 = vmatpush1.msra.mxu0 %v390_v22  ;;  %664 = vmatpush1.msra.mxu1 %v392_v23  ;;  %v397_v37 = vld [vmem:[%s3361_s19 + $0x3b8] sm:$0xff]  ;;  %v394_v38 = vld [vmem:[%s3361_s19 + $0x3a0] sm:$0xff]  ;;  %v396_v39 = vld [vmem:[%s3361_s19 + $0x3b0] sm:$0xff] }
  0x24   : > { %594 = vmatprep.subr.mxu0 %v355_v24  ;;  %665 = vmatprep.subr.mxu1 %v357_v25  ;;  %v359_v40 = vld [vmem:[%s3361_s19 + $0x288] sm:$0xff]  ;;  %v361_v41 = vld [vmem:[%s3361_s19 + $0x298] sm:$0xff]  ;;  %v358_v42 = vld [vmem:[%s3361_s19 + $0x280] sm:$0xff] }
  0x25   : > { %595 = vmatpush1.msra.mxu0 %v354_v26  ;;  %666 = vmatpush1.msra.mxu1 %v356_v27  ;;  %v360_v43 = vld [vmem:[%s3361_s19 + $0x290] sm:$0xff]  ;;  %v323_v44 = vld [vmem:[%s3361_s19 + $0x168] sm:$0xff]  ;;  %v325_v45 = vld [vmem:[%s3361_s19 + $0x178] sm:$0xff] }
  0x26   : > { %596 = vmatprep.subr.mxu0 %v319_v28  ;;  %667 = vmatprep.subr.mxu1 %v321_v29  ;;  %v322_v46 = vld [vmem:[%s3361_s19 + $0x160] sm:$0xff]  ;;  %v324_v47 = vld [vmem:[%s3361_s19 + $0x170] sm:$0xff]  ;;  %v287_v48 = vld [vmem:[%s3361_s19 + $0x48] sm:$0xff] }
  0x27   : > { %597 = vmatpush1.msra.mxu0 %v318_v30  ;;  %668 = vmatpush1.msra.mxu1 %v320_v31  ;;  %v289_v49 = vld [vmem:[%s3361_s19 + $0x58] sm:$0xff]  ;;  %v286_v50 = vld [vmem:[%s3361_s19 + $0x40] sm:$0xff]  ;;  %v288_v51 = vld [vmem:[%s3361_s19 + $0x50] sm:$0xff] }
  0x28   : > { %598 = vmatprep.subr.mxu0 %v283_v32  ;;  %669 = vmatprep.subr.mxu1 %v285_v33  ;;  %v399_v52 = vld [vmem:[%s3361_s19 + $0x3c8] sm:$0xff]  ;;  %v401_v53 = vld [vmem:[%s3361_s19 + $0x3d8] sm:$0xff]  ;;  %v398_v54 = vld [vmem:[%s3361_s19 + $0x3c0] sm:$0xff] }
  0x29   : > { %599 = vmatpush1.msra.mxu0 %v282_v34  ;;  %632 = vmatprep.mubr.f32.mxu0 %v3246_v1  ;;  %v400_v55 = vld [vmem:[%s3361_s19 + $0x3d0] sm:$0xff]  ;;  %v363_v56 = vld [vmem:[%s3361_s19 + $0x2a8] sm:$0xff]  ;;  %v365_v57 = vld [vmem:[%s3361_s19 + $0x2b8] sm:$0xff] }
  0x2a   : > { %670 = vmatpush1.msra.mxu1 %v284_v35  ;;  %3078 = vmatmul.mubr.msk.f32.vlgmr.msra.gmra.mxu0 %vm422_vm0, %v3382_v19  ;;  %v362_v58 = vld [vmem:[%s3361_s19 + $0x2a0] sm:$0xff]  ;;  %v364_v59 = vld [vmem:[%s3361_s19 + $0x2b0] sm:$0xff]  ;;  %v327_v60 = vld [vmem:[%s3361_s19 + $0x188] sm:$0xff] }
  0x2b   : > { %703 = vmatprep.mubr.f32.mxu1 %v3246_v1  ;;  %734 = vmatprep.subr.mxu0 %v395_v36  ;;  %v329_v61 = vld [vmem:[%s3361_s19 + $0x198] sm:$0xff]  ;;  %v326_v62 = vld [vmem:[%s3361_s19 + $0x180] sm:$0xff]  ;;  %v328_v63 = vld [vmem:[%s3361_s19 + $0x190] sm:$0xff] }
  0x2c   : > { %805 = vmatprep.subr.mxu1 %v397_v37  ;;  %3079 = vmatmul.mubr.msk.f32.vlgmr.msra.gmra.mxu1 %vm422_vm0, %v3382_v19  ;;  %v291_v0 = vld [vmem:[%s3361_s19 + $0x68] sm:$0xff]  ;;  %v293_v2 = vld [vmem:[%s3361_s19 + $0x78] sm:$0xff]  ;;  %v290_v3 = vld [vmem:[%s3361_s19 + $0x60] sm:$0xff] }
  0x2d   : > { %735 = vmatpush1.msra.mxu0 %v394_v38  ;;  %806 = vmatpush1.msra.mxu1 %v396_v39  ;;  %v292_v4 = vld [vmem:[%s3361_s19 + $0x70] sm:$0xff]  ;;  %v403_v5 = vld [vmem:[%s3361_s19 + $0x3e8] sm:$0xff]  ;;  %v405_v6 = vld [vmem:[%s3361_s19 + $0x3f8] sm:$0xff] }
  0x2e   : > { %736 = vmatprep.subr.mxu0 %v359_v40  ;;  %807 = vmatprep.subr.mxu1 %v361_v41  ;;  %v402_v7 = vld [vmem:[%s3361_s19 + $0x3e0] sm:$0xff]  ;;  %v404_v8 = vld [vmem:[%s3361_s19 + $0x3f0] sm:$0xff]  ;;  %v367_v9 = vld [vmem:[%s3361_s19 + $0x2c8] sm:$0xff] }
  0x2f   : > { %737 = vmatpush1.msra.mxu0 %v358_v42  ;;  %808 = vmatpush1.msra.mxu1 %v360_v43  ;;  %v369_v10 = vld [vmem:[%s3361_s19 + $0x2d8] sm:$0xff]  ;;  %v366_v11 = vld [vmem:[%s3361_s19 + $0x2c0] sm:$0xff]  ;;  %v368_v12 = vld [vmem:[%s3361_s19 + $0x2d0] sm:$0xff] }
  0x30   : > { %738 = vmatprep.subr.mxu0 %v323_v44  ;;  %809 = vmatprep.subr.mxu1 %v325_v45  ;;  %v331_v13 = vld [vmem:[%s3361_s19 + $0x1a8] sm:$0xff]  ;;  %v333_v14 = vld [vmem:[%s3361_s19 + $0x1b8] sm:$0xff]  ;;  %v330_v15 = vld [vmem:[%s3361_s19 + $0x1a0] sm:$0xff] }
  0x31   : > { %739 = vmatpush1.msra.mxu0 %v322_v46  ;;  %810 = vmatpush1.msra.mxu1 %v324_v47  ;;  %v332_v16 = vld [vmem:[%s3361_s19 + $0x1b0] sm:$0xff]  ;;  %v295_v17 = vld [vmem:[%s3361_s19 + $0x88] sm:$0xff]  ;;  %v297_v18 = vld [vmem:[%s3361_s19 + $0x98] sm:$0xff] }
  0x32   : > { %740 = vmatprep.subr.mxu0 %v287_v48  ;;  %811 = vmatprep.subr.mxu1 %v289_v49  ;;  %v294_v20 = vld [vmem:[%s3361_s19 + $0x80] sm:$0xff]  ;;  %v296_v21 = vld [vmem:[%s3361_s19 + $0x90] sm:$0xff]  ;;  %v407_v22 = vld [vmem:[%s3361_s19 + $0x408] sm:$0xff] }
  0x33   : > { %741 = vmatpush1.msra.mxu0 %v286_v50  ;;  %774 = vmatprep.mubr.f32.mxu0 %v3246_v1  ;;  %v409_v23 = vld [vmem:[%s3361_s19 + $0x418] sm:$0xff]  ;;  %v406_v24 = vld [vmem:[%s3361_s19 + $0x400] sm:$0xff]  ;;  %v408_v25 = vld [vmem:[%s3361_s19 + $0x410] sm:$0xff] }
  0x34   : > { %812 = vmatpush1.msra.mxu1 %v288_v51  ;;  %845 = vmatprep.mubr.f32.mxu1 %v3246_v1  ;;  %v371_v26 = vld [vmem:[%s3361_s19 + $0x2e8] sm:$0xff]  ;;  %v373_v27 = vld [vmem:[%s3361_s19 + $0x2f8] sm:$0xff]  ;;  %v370_v28 = vld [vmem:[%s3361_s19 + $0x2e0] sm:$0xff] }
  0x35   : > { %3080 = vmatmul.mubr.msk.f32.vlgmr.msra.gmra.mxu0 %vm422_vm0, %v3382_v19  ;;  %3081 = vmatmul.mubr.msk.f32.vlgmr.msra.gmra.mxu1 %vm422_vm0, %v3382_v19  ;;  %v372_v29 = vld [vmem:[%s3361_s19 + $0x2f0] sm:$0xff]  ;;  %v335_v30 = vld [vmem:[%s3361_s19 + $0x1c8] sm:$0xff]  ;;  %v337_v31 = vld [vmem:[%s3361_s19 + $0x1d8] sm:$0xff] }
  0x36   : > { %876 = vmatprep.subr.mxu0 %v399_v52  ;;  %947 = vmatprep.subr.mxu1 %v401_v53  ;;  %v334_v32 = vld [vmem:[%s3361_s19 + $0x1c0] sm:$0xff]  ;;  %v336_v33 = vld [vmem:[%s3361_s19 + $0x1d0] sm:$0xff]  ;;  %v299_v34 = vld [vmem:[%s3361_s19 + $0xa8] sm:$0xff] }
  0x37   : > { %877 = vmatpush1.msra.mxu0 %v398_v54  ;;  %948 = vmatpush1.msra.mxu1 %v400_v55  ;;  %v301_v35 = vld [vmem:[%s3361_s19 + $0xb8] sm:$0xff]  ;;  %v298_v36 = vld [vmem:[%s3361_s19 + $0xa0] sm:$0xff]  ;;  %v300_v37 = vld [vmem:[%s3361_s19 + $0xb0] sm:$0xff] }
  0x38   : > { %878 = vmatprep.subr.mxu0 %v363_v56  ;;  %949 = vmatprep.subr.mxu1 %v365_v57  ;;  %v411_v38 = vld [vmem:[%s3361_s19 + $0x428] sm:$0xff]  ;;  %v413_v39 = vld [vmem:[%s3361_s19 + $0x438] sm:$0xff]  ;;  %v410_v40 = vld [vmem:[%s3361_s19 + $0x420] sm:$0xff] }
  0x39   : > { %879 = vmatpush1.msra.mxu0 %v362_v58  ;;  %950 = vmatpush1.msra.mxu1 %v364_v59  ;;  %v412_v41 = vld [vmem:[%s3361_s19 + $0x430] sm:$0xff]  ;;  %v375_v42 = vld [vmem:[%s3361_s19 + $0x308] sm:$0xff]  ;;  %v377_v43 = vld [vmem:[%s3361_s19 + $0x318] sm:$0xff] }
  0x3a   : > { %880 = vmatprep.subr.mxu0 %v327_v60  ;;  %951 = vmatprep.subr.mxu1 %v329_v61  ;;  %v374_v44 = vld [vmem:[%s3361_s19 + $0x300] sm:$0xff]  ;;  %v376_v45 = vld [vmem:[%s3361_s19 + $0x310] sm:$0xff]  ;;  %v339_v46 = vld [vmem:[%s3361_s19 + $0x1e8] sm:$0xff] }
  0x3b   : > { %881 = vmatpush1.msra.mxu0 %v326_v62  ;;  %952 = vmatpush1.msra.mxu1 %v328_v63  ;;  %v341_v47 = vld [vmem:[%s3361_s19 + $0x1f8] sm:$0xff]  ;;  %v338_v48 = vld [vmem:[%s3361_s19 + $0x1e0] sm:$0xff]  ;;  %v340_v49 = vld [vmem:[%s3361_s19 + $0x1f0] sm:$0xff] }
  0x3c   : > { %882 = vmatprep.subr.mxu0 %v291_v0  ;;  %953 = vmatprep.subr.mxu1 %v293_v2  ;;  %v303_v50 = vld [vmem:[%s3361_s19 + $0xc8] sm:$0xff]  ;;  %v305_v51 = vld [vmem:[%s3361_s19 + $0xd8] sm:$0xff]  ;;  %v302_v52 = vld [vmem:[%s3361_s19 + $0xc0] sm:$0xff] }
  0x3d   : > { %883 = vmatpush1.msra.mxu0 %v290_v3  ;;  %916 = vmatprep.mubr.f32.mxu0 %v3246_v1  ;;  %v304_v53 = vld [vmem:[%s3361_s19 + $0xd0] sm:$0xff]  ;;  %v415_v54 = vld [vmem:[%s3361_s19 + $0x448] sm:$0xff]  ;;  %v417_v55 = vld [vmem:[%s3361_s19 + $0x458] sm:$0xff] }
  0x3e   : > { %954 = vmatpush1.msra.mxu1 %v292_v4  ;;  %987 = vmatprep.mubr.f32.mxu1 %v3246_v1  ;;  %v414_v56 = vld [vmem:[%s3361_s19 + $0x440] sm:$0xff]  ;;  %v416_v57 = vld [vmem:[%s3361_s19 + $0x450] sm:$0xff]  ;;  %v379_v58 = vld [vmem:[%s3361_s19 + $0x328] sm:$0xff] }
  0x3f   : > { %3082 = vmatmul.mubr.msk.f32.vlgmr.msra.gmra.mxu0 %vm422_vm0, %v3382_v19  ;;  %3083 = vmatmul.mubr.msk.f32.vlgmr.msra.gmra.mxu1 %vm422_vm0, %v3382_v19  ;;  %v381_v59 = vld [vmem:[%s3361_s19 + $0x338] sm:$0xff]  ;;  %v378_v60 = vld [vmem:[%s3361_s19 + $0x320] sm:$0xff]  ;;  %v380_v61 = vld [vmem:[%s3361_s19 + $0x330] sm:$0xff] }
  0x40   : > { %1018 = vmatprep.subr.mxu0 %v403_v5  ;;  %1089 = vmatprep.subr.mxu1 %v405_v6  ;;  %v343_v62 = vld [vmem:[%s3361_s19 + $0x208] sm:$0xff]  ;;  %v345_v63 = vld [vmem:[%s3361_s19 + $0x218] sm:$0xff]  ;;  %v342_v0 = vld [vmem:[%s3361_s19 + $0x200] sm:$0xff] }
  0x41   : > { %1019 = vmatpush1.msra.mxu0 %v402_v7  ;;  %1090 = vmatpush1.msra.mxu1 %v404_v8  ;;  %v344_v2 = vld [vmem:[%s3361_s19 + $0x210] sm:$0xff]  ;;  %v307_v3 = vld [vmem:[%s3361_s19 + $0xe8] sm:$0xff]  ;;  %v309_v4 = vld [vmem:[%s3361_s19 + $0xf8] sm:$0xff] }
  0x42   : > { %1020 = vmatprep.subr.mxu0 %v367_v9  ;;  %1091 = vmatprep.subr.mxu1 %v369_v10  ;;  %v306_v5 = vld [vmem:[%s3361_s19 + $0xe0] sm:$0xff]  ;;  %v308_v6 = vld [vmem:[%s3361_s19 + $0xf0] sm:$0xff]  ;;  %v419_v7 = vld [vmem:[%s3361_s19 + $0x468] sm:$0xff] }
  0x43   : > { %1021 = vmatpush1.msra.mxu0 %v366_v11  ;;  %1092 = vmatpush1.msra.mxu1 %v368_v12  ;;  %v421_v8 = vld [vmem:[%s3361_s19 + $0x478] sm:$0xff]  ;;  %v418_v9 = vld [vmem:[%s3361_s19 + $0x460] sm:$0xff]  ;;  %v420_v10 = vld [vmem:[%s3361_s19 + $0x470] sm:$0xff] }
  0x44   : > { %1022 = vmatprep.subr.mxu0 %v331_v13  ;;  %1093 = vmatprep.subr.mxu1 %v333_v14  ;;  %v383_v11 = vld [vmem:[%s3361_s19 + $0x348] sm:$0xff]  ;;  %v385_v12 = vld [vmem:[%s3361_s19 + $0x358] sm:$0xff]  ;;  %v382_v13 = vld [vmem:[%s3361_s19 + $0x340] sm:$0xff] }
  0x45   : > { %1023 = vmatpush1.msra.mxu0 %v330_v15  ;;  %1094 = vmatpush1.msra.mxu1 %v332_v16  ;;  %v384_v14 = vld [vmem:[%s3361_s19 + $0x350] sm:$0xff]  ;;  %v347_v15 = vld [vmem:[%s3361_s19 + $0x228] sm:$0xff]  ;;  %v349_v16 = vld [vmem:[%s3361_s19 + $0x238] sm:$0xff] }
  0x46   : > { %1024 = vmatprep.subr.mxu0 %v295_v17  ;;  %1095 = vmatprep.subr.mxu1 %v297_v18  ;;  %v346_v17 = vld [vmem:[%s3361_s19 + $0x220] sm:$0xff]  ;;  %v348_v18 = vld [vmem:[%s3361_s19 + $0x230] sm:$0xff] }
  0x47   : > { %1025 = vmatpush1.msra.mxu0 %v294_v20  ;;  %1058 = vmatprep.mubr.f32.mxu0 %v3246_v1  ;;  %v311_v20 = vld [vmem:[%s3361_s19 + $0x108] sm:$0xff] }
  0x48   : > { %1096 = vmatpush1.msra.mxu1 %v296_v21  ;;  %3084 = vmatmul.mubr.msk.f32.vlgmr.msra.gmra.mxu0 %vm422_vm0, %v3382_v19  ;;  %v313_v21 = vld [vmem:[%s3361_s19 + $0x118] sm:$0xff] }
  0x49   : > { %1129 = vmatprep.mubr.f32.mxu1 %v3246_v1  ;;  %1160 = vmatprep.subr.mxu0 %v407_v22  ;;  %v310_v22 = vld [vmem:[%s3361_s19 + $0x100] sm:$0xff] }
  0x4a   : > { %1231 = vmatprep.subr.mxu1 %v409_v23  ;;  %3085 = vmatmul.mubr.msk.f32.vlgmr.msra.gmra.mxu1 %vm422_vm0, %v3382_v19  ;;  %v312_v23 = vld [vmem:[%s3361_s19 + $0x110] sm:$0xff]  ;;  %s4689_s19 = smov 96  }
  0x4b   : > { %1161 = vmatpush1.msra.mxu0 %v406_v24  ;;  %1232 = vmatpush1.msra.mxu1 %v408_v25 }
  0x4c   : > { %1162 = vmatprep.subr.mxu0 %v371_v26  ;;  %1233 = vmatprep.subr.mxu1 %v373_v27 }
  0x4d   : > { %1163 = vmatpush1.msra.mxu0 %v370_v28  ;;  %1234 = vmatpush1.msra.mxu1 %v372_v29 }
  0x4e   : > { %1164 = vmatprep.subr.mxu0 %v335_v30  ;;  %1235 = vmatprep.subr.mxu1 %v337_v31 }
  0x4f   : > { %1165 = vmatpush1.msra.mxu0 %v334_v32  ;;  %1236 = vmatpush1.msra.mxu1 %v336_v33 }
  0x50   : > { %1166 = vmatprep.subr.mxu0 %v299_v34  ;;  %1237 = vmatprep.subr.mxu1 %v301_v35  ;;  %v2396_v34 = vld [vmem:[%s4666_s3 + $0xf8] sm:$0xff]  ;;  %v2395_v35 = vld [vmem:[%s4666_s3 + $0xf0] sm:$0xff] }
  0x51   : > { %1167 = vmatpush1.msra.mxu0 %v298_v36  ;;  %1200 = vmatprep.mubr.f32.mxu0 %v3246_v1  ;;  %v2394_v36 = vld [vmem:[%s4666_s3 + $0xe8] sm:$0xff] }
  0x52   : > { %1238 = vmatpush1.msra.mxu1 %v300_v37  ;;  %3086 = vmatmul.mubr.msk.f32.vlgmr.msra.gmra.mxu0 %vm422_vm0, %v3382_v19 }
  0x53   : > { %1271 = vmatprep.mubr.f32.mxu1 %v3246_v1  ;;  %1302 = vmatprep.subr.mxu0 %v411_v38  ;;  %v2393_v38 = vld [vmem:[%s4666_s3 + $0xe0] sm:$0xff] }
  0x54   : > { %1373 = vmatprep.subr.mxu1 %v413_v39  ;;  %3087 = vmatmul.mubr.msk.f32.vlgmr.msra.gmra.mxu1 %vm422_vm0, %v3382_v19  ;;  %v2392_v39 = vld [vmem:[%s4666_s3 + $0xd8] sm:$0xff] }
  0x55   : > { %1303 = vmatpush1.msra.mxu0 %v410_v40  ;;  %1374 = vmatpush1.msra.mxu1 %v412_v41  ;;  %v2391_v41 = vld [vmem:[%s4666_s3 + $0xd0] sm:$0xff] }
  0x56   : > { %1304 = vmatprep.subr.mxu0 %v375_v42  ;;  %1375 = vmatprep.subr.mxu1 %v377_v43  ;;  %v2390_v42 = vld [vmem:[%s4666_s3 + $0xc8] sm:$0xff] }
  0x57   : > { %1305 = vmatpush1.msra.mxu0 %v374_v44  ;;  %1376 = vmatpush1.msra.mxu1 %v376_v45  ;;  %v2389_v45 = vld [vmem:[%s4666_s3 + $0xc0] sm:$0xff] }
  0x58   : > { %1306 = vmatprep.subr.mxu0 %v339_v46  ;;  %1377 = vmatprep.subr.mxu1 %v341_v47  ;;  %v2388_v46 = vld [vmem:[%s4666_s3 + $0xb8] sm:$0xff] }
  0x59   : > { %1307 = vmatpush1.msra.mxu0 %v338_v48  ;;  %1378 = vmatpush1.msra.mxu1 %v340_v49  ;;  %v2387_v48 = vld [vmem:[%s4666_s3 + $0xb0] sm:$0xff]  ;;  %v2386_v49 = vld [vmem:[%s4666_s3 + $0xa8] sm:$0xff] }
  0x5a   : > { %1308 = vmatprep.subr.mxu0 %v303_v50  ;;  %1379 = vmatprep.subr.mxu1 %v305_v51  ;;  %v2385_v51 = vld [vmem:[%s4666_s3 + $0xa0] sm:$0xff] }
  0x5b   : > { %1309 = vmatpush1.msra.mxu0 %v302_v52  ;;  %1342 = vmatprep.mubr.f32.mxu0 %v3246_v1  ;;  %v2384_v52 = vld [vmem:[%s4666_s3 + $0x98] sm:$0xff] }
  0x5c   : > { %1380 = vmatpush1.msra.mxu1 %v304_v53  ;;  %1413 = vmatprep.mubr.f32.mxu1 %v3246_v1 }
  0x5d   : > { %3088 = vmatmul.mubr.msk.f32.vlgmr.msra.gmra.mxu0 %vm422_vm0, %v3382_v19  ;;  %3089 = vmatmul.mubr.msk.f32.vlgmr.msra.gmra.mxu1 %vm422_vm0, %v3382_v19 }
  0x5e   : > { %1444 = vmatprep.subr.mxu0 %v415_v54  ;;  %1515 = vmatprep.subr.mxu1 %v417_v55  ;;  %v2383_v55 = vld [vmem:[%s4666_s3 + $0x90] sm:$0xff] }
  0x5f   : > { %1445 = vmatpush1.msra.mxu0 %v414_v56  ;;  %1516 = vmatpush1.msra.mxu1 %v416_v57  ;;  %v2382_v56 = vld [vmem:[%s4666_s3 + $0x88] sm:$0xff] }
  0x60   : > { %1446 = vmatprep.subr.mxu0 %v379_v58  ;;  %1517 = vmatprep.subr.mxu1 %v381_v59  ;;  %v2381_v58 = vld [vmem:[%s4666_s3 + $0x80] sm:$0xff]  ;;  %v2380_v59 = vld [vmem:[%s4666_s3 + $0x78] sm:$0xff] }
  0x61   : > { %1447 = vmatpush1.msra.mxu0 %v378_v60  ;;  %1518 = vmatpush1.msra.mxu1 %v380_v61  ;;  %v2379_v61 = vld [vmem:[%s4666_s3 + $0x70] sm:$0xff] }
  0x62   : > { %1448 = vmatprep.subr.mxu0 %v343_v62  ;;  %1519 = vmatprep.subr.mxu1 %v345_v63  ;;  %v2378_v62 = vld [vmem:[%s4666_s3 + $0x68] sm:$0xff] }
  0x63   : > { %1449 = vmatpush1.msra.mxu0 %v342_v0  ;;  %1520 = vmatpush1.msra.mxu1 %v344_v2  ;;  %v2377_v2 = vld [vmem:[%s4666_s3 + $0x60] sm:$0xff] }
  0x64   : > { %1450 = vmatprep.subr.mxu0 %v307_v3  ;;  %1521 = vmatprep.subr.mxu1 %v309_v4  ;;  %v2376_v3 = vld [vmem:[%s4666_s3 + $0x58] sm:$0xff] }
  0x65   : > { %1451 = vmatpush1.msra.mxu0 %v306_v5  ;;  %1484 = vmatprep.mubr.f32.mxu0 %v3246_v1  ;;  %v2375_v5 = vld [vmem:[%s4666_s3 + $0x50] sm:$0xff] }
  0x66   : > { %1522 = vmatpush1.msra.mxu1 %v308_v6  ;;  %1555 = vmatprep.mubr.f32.mxu1 %v3246_v1  ;;  %v2374_v6 = vld [vmem:[%s4666_s3 + $0x48] sm:$0xff] }
  0x67   : > { %3090 = vmatmul.mubr.msk.f32.vlgmr.msra.gmra.mxu0 %vm422_vm0, %v3382_v19  ;;  %3091 = vmatmul.mubr.msk.f32.vlgmr.msra.gmra.mxu1 %vm422_vm0, %v3382_v19 }
  0x68   : > { %1586 = vmatprep.subr.mxu0 %v419_v7  ;;  %1657 = vmatprep.subr.mxu1 %v421_v8 }
  0x69   : > { %1587 = vmatpush1.msra.mxu0 %v418_v9  ;;  %1658 = vmatpush1.msra.mxu1 %v420_v10  ;;  %v2373_v9 = vld [vmem:[%s4666_s3 + $0x40] sm:$0xff] }
  0x6a   : > { %1588 = vmatprep.subr.mxu0 %v383_v11  ;;  %1659 = vmatprep.subr.mxu1 %v385_v12  ;;  %v2372_v12 = vld [vmem:[%s4666_s3 + $0x38] sm:$0xff] }
  0x6b   : > { %1589 = vmatpush1.msra.mxu0 %v382_v13  ;;  %1660 = vmatpush1.msra.mxu1 %v384_v14 }
  0x6c   : > { %1590 = vmatprep.subr.mxu0 %v347_v15  ;;  %1661 = vmatprep.subr.mxu1 %v349_v16  ;;  %v2371_v15 = vld [vmem:[%s4666_s3 + $0x30] sm:$0xff] }
  0x6d   : > { %1591 = vmatpush1.msra.mxu0 %v346_v17  ;;  %1662 = vmatpush1.msra.mxu1 %v348_v18  ;;  %v2370_v17 = vld [vmem:[%s4666_s3 + $0x28] sm:$0xff] }
  0x6e   : > { %1592 = vmatprep.subr.mxu0 %v311_v20  ;;  %1663 = vmatprep.subr.mxu1 %v313_v21 }
  0x6f   : > { %1593 = vmatpush1.msra.mxu0 %v310_v22  ;;  %1626 = vmatprep.mubr.f32.mxu0 %v3246_v1 }
  0x70   : > { %1664 = vmatpush1.msra.mxu1 %v312_v23  ;;  %1697 = vmatprep.mubr.f32.mxu1 %v3246_v1 }
  0x71   : > { %3092 = vmatmul.mubr.msk.f32.vlgmr.msra.gmra.mxu0 %vm422_vm0, %v3382_v19  ;;  %3093 = vmatmul.mubr.msk.f32.vlgmr.msra.gmra.mxu1 %vm422_vm0, %v3382_v19 }
  0x72   : > { %2601 = vmatprep.subr.mxu0 %v2396_v34 }
  0x73   : > { %2602 = vmatpush1.msra.mxu0 %v2395_v35 }
  0x74   : > { %2603 = vmatprep.subr.mxu0 %v2394_v36 }
  0x75   : > { %2604 = vmatpush1.msra.mxu0 %v2393_v38 }
  0x76   : > { %2605 = vmatprep.subr.mxu0 %v2392_v39 }
  0x77   : > { %2606 = vmatpush1.msra.mxu0 %v2391_v41 }
  0x78   : > { %2607 = vmatprep.subr.mxu0 %v2390_v42 }
  0x79   : > { %2608 = vmatpush1.msra.mxu0 %v2389_v45 }
  0x7a   : > { %2609 = vmatprep.subr.mxu0 %v2388_v46 }
  0x7b   : > { %2610 = vmatpush1.msra.mxu0 %v2387_v48 }
  0x7c   : > { %2611 = vmatprep.subr.mxu0 %v2386_v49 }
  0x7d   : > { %2612 = vmatpush1.msra.mxu0 %v2385_v51 }
  0x7e   : > { %2613 = vmatprep.subr.mxu0 %v2384_v52 }
  0x7f   : > { %2614 = vmatpush1.msra.mxu0 %v2383_v55  ;;  %v2367_v55 = vld [vmem:[%s4666_s3 + $0x10] sm:$0xff] }
  0x80   : > { %2615 = vmatprep.subr.mxu0 %v2382_v56  ;;  %v2459_v56 = vld [vmem:[%s4666_s3 + $0x2f0] sm:$0xff] }
  0x81   : > { %2616 = vmatpush1.msra.mxu0 %v2381_v58 }
  0x82   : > { %2617 = vmatprep.subr.mxu0 %v2380_v59 }
  0x83   : > { %2618 = vmatpush1.msra.mxu0 %v2379_v61 }
  0x84   : > { %2619 = vmatprep.subr.mxu0 %v2378_v62  ;;  %v2458_v62 = vld [vmem:[%s4666_s3 + $0x2e8] sm:$0xff] }
  0x85   : > { %2620 = vmatpush1.msra.mxu0 %v2377_v2 }
  0x86   : > { %2621 = vmatprep.subr.mxu0 %v2376_v3 }
  0x87   : > { %2622 = vmatpush1.msra.mxu0 %v2375_v5 }
  0x88   : > { %2623 = vmatprep.subr.mxu0 %v2374_v6 }
  0x89   : > { %2624 = vmatpush1.msra.mxu0 %v2373_v9 }
  0x8a   : > { %2625 = vmatprep.subr.mxu0 %v2372_v12 }
  0x8b   : > { %2626 = vmatpush1.msra.mxu0 %v2371_v15 }
  0x8c   : > { %2627 = vmatprep.subr.mxu0 %v2370_v17  ;;  %v2453_v17 = vld [vmem:[%s4666_s3 + $0x2c0] sm:$0xff] }
  0x91   : > { %v3680_v14 = vpop.permute.xlu0 %1806 }
  0xe1   : > { %v3566_v25 = vpop.f32.mrf.mxu0 }
  0xe2   : > { %v3564_v24 = vpop.f32.mrf.mxu1 }
  0xe3   : > { %v3572_v28 = vpop.f32.mrf.mxu0 }
  0xe4   : > { %v3568_v26 = vpop.f32.mrf.mxu1 }
  0xea   : > { %v3574_v29 = vpop.f32.mrf.mxu0 }
  0xec   : > { %v3570_v27 = vpop.f32.mrf.mxu1  ;;  %v3580_v32 = vpop.f32.mrf.mxu0 }
  0xee   : > { %v3576_v30 = vpop.f32.mrf.mxu1 }
  0xf5   : > { %v3578_v31 = vpop.f32.mrf.mxu1  ;;  %v3582_v33 = vpop.f32.mrf.mxu0 }
  0xf7   : > { %v3584_v19 = vpop.f32.mrf.mxu1  ;;  %v778_v40 = vpop.f32.mrf.mxu0 }
  0xf8   : > { %v1776_v10 = vmax.f32 %v3566_v25, %v778_v40  ;;  %v1777_v25 = vmax.f32 %v3572_v28, %v3578_v31  ;;  %v1778_v38 = vmax.f32 %v3564_v24, %v3584_v19  ;;  %v2368_v19 = vld [vmem:[%s4666_s3 + $0x18] sm:$0xff] }
  0xff   : > { %v3595_v37 = vpop.f32.mrf.mxu1  ;;  %v3609_v43 = vpop.f32.mrf.mxu0 }
 0x100   : > { %v1779_v34 = vmax.f32 %v3568_v26, %v3609_v43  ;;  %v1781_v58 = vmax.f32 %v3580_v32, %v3595_v37  ;;  %v2365_v32 = vld [vmem:[%s4666_s3] sm:$0xff] }
 0x101   : > { %v3611_v44 = vpop.f32.mrf.mxu1  ;;  %v3625_v50 = vpop.f32.mrf.mxu0  ;;  %v2457_v37 = vld [vmem:[%s4666_s3 + $0x2e0] sm:$0xff] }
 0x102   : > { %v1780_v39 = vmax.f32 %v3574_v29, %v3625_v50  ;;  %v2369_v29 = vld [vmem:[%s4666_s3 + $0x20] sm:$0xff]  ;;  %v2460_v50 = vld [vmem:[%s4666_s3 + $0x2f8] sm:$0xff] }
 0x103   : > { %2628 = vmatpush1.msra.mxu0 %v2369_v29  ;;  %2672 = vmatprep.subr.mxu1 %v2460_v50  ;;  %v2450_v29 = vld [vmem:[%s4666_s3 + $0x2a8] sm:$0xff]  ;;  %v2449_v50 = vld [vmem:[%s4666_s3 + $0x2a0] sm:$0xff] }
 0x104   : > { %2629 = vmatprep.subr.mxu0 %v2368_v19  ;;  %2673 = vmatpush1.msra.mxu1 %v2459_v56  ;;  %v2421_v19 = vld [vmem:[%s4666_s3 + $0x1c0] sm:$0xff]  ;;  %v2419_v56 = vld [vmem:[%s4666_s3 + $0x1b0] sm:$0xff] }
 0x105   : > { %2630 = vmatpush1.msra.mxu0 %v2367_v55  ;;  %2674 = vmatprep.subr.mxu1 %v2458_v62  ;;  %v2448_v55 = vld [vmem:[%s4666_s3 + $0x298] sm:$0xff]  ;;  %v2417_v62 = vld [vmem:[%s4666_s3 + $0x1a0] sm:$0xff] }
 0x106   : > { %2675 = vmatpush1.msra.mxu1 %v2457_v37 }
 0x108   : > { %v3633_v53 = vpop.f32.mrf.mxu0 }
 0x10a   : > { %v1131_v47 = vpop.f32.mrf.mxu1  ;;  %v3647_v60 = vpop.f32.mrf.mxu0 }
 0x10c   : > { %v1133_v54 = vpop.f32.mrf.mxu1 }
 0x112   : > { %v1202_v63 = vpop.f32.mrf.mxu0 }
 0x114   : > { %v1273_v57 = vpop.f32.mrf.mxu1  ;;  %v1204_v7 = vpop.f32.mrf.mxu0 }
 0x116   : > { %v3655_v0 = vpop.f32.mrf.mxu1 }
 0x11d   : > { %v3663_v4 = vpop.f32.mrf.mxu1  ;;  %v3678_v13 = vpop.f32.mrf.mxu0 }
 0x11f   : > { %v1417_v8 = vpop.f32.mrf.mxu1  ;;  %v3689_v20 = vpop.f32.mrf.mxu0 }
 0x120   : > { %v1785_v11 = vmax.f32 %v1131_v47, %v1417_v8 }
 0x122   : > { %v1794_v16 = vmax.f32 %v1776_v10, %v1785_v11 }
 0x124   : > { %v1809_v18 = vadd.f32 %v3680_v14, %v1794_v16  ;;  %v2425_v16 = vld [vmem:[%s4666_s3 + $0x1e0] sm:$0xff] }
 0x126   : > { %v1818_v21 = vmax.f32 %v1809_v18, 0.0  ;;  %v2424_v18 = vld [vmem:[%s4666_s3 + $0x1d8] sm:$0xff] }
 0x127   : > { %v1486_v22 = vpop.f32.mrf.mxu0  ;;  %v1557_v23 = vpop.f32.mrf.mxu1 }
 0x128   : > { %1827 = vst [vmem:[#allocation3] sm:$0xff] %v1818_v21  ;;  %v1786_v35 = vmax.f32 %v1133_v54, %v1486_v22  ;;  %v1788_v36 = vmax.f32 %v1204_v7, %v1557_v23  ;;  %v2456_v7 = vld [vmem:[%s4666_s3 + $0x2d8] sm:$0xff] }
 0x129   : > { %v1488_v40 = vpop.f32.mrf.mxu0  ;;  %v1559_v41 = vpop.f32.mrf.mxu1  ;;  %2676 = vmatprep.subr.mxu1 %v2456_v7  ;;  %v2413_v7 = vld [vmem:[%s4666_s3 + $0x180] sm:$0xff] }
 0x12a   : > { %v1795_v42 = vmax.f32 %v1777_v25, %v1786_v35  ;;  %v1797_v45 = vmax.f32 %v1779_v34, %v1788_v36  ;;  %v1787_v46 = vmax.f32 %v1202_v63, %v1488_v40  ;;  %v1789_v47 = vmax.f32 %v1273_v57, %v1559_v41  ;;  %v2366_v57 = vld [vmem:[%s4666_s3 + $0x8] sm:$0xff]  ;;  %v2452_v34 = vld [vmem:[%s4666_s3 + $0x2b8] sm:$0xff] }
 0x12b   : > { %v1783_v63 = vmax.f32 %v3576_v30, %v3633_v53  ;;  %2631 = vmatprep.subr.mxu0 %v2366_v57  ;;  %v2428_v30 = vld [vmem:[%s4666_s3 + $0x1f8] sm:$0xff]  ;;  %v1782_v53 = vmax.f32 %v3570_v27, %v3611_v44  ;;  %v2427_v27 = vld [vmem:[%s4666_s3 + $0x1f0] sm:$0xff]  ;;  %v2426_v44 = vld [vmem:[%s4666_s3 + $0x1e8] sm:$0xff] }
 0x12c   : > { %v1810_v28 = vadd.f32 %v3680_v14, %v1795_v42  ;;  %v1812_v31 = vadd.f32 %v3680_v14, %v1797_v45  ;;  %v1796_v26 = vmax.f32 %v1778_v38, %v1787_v46  ;;  %v1798_v43 = vmax.f32 %v1780_v39, %v1789_v47  ;;  %2632 = vmatpush1.msra.mxu0 %v2365_v32  ;;  %v2447_v57 = vld [vmem:[%s4666_s3 + $0x290] sm:$0xff]  ;;  %v2444_v32 = vld [vmem:[%s4666_s3 + $0x278] sm:$0xff] }
 0x12d   : > { %2633 = vmatprep.subr.mxu0 %v2428_v30  ;;  %v2415_v30 = vld [vmem:[%s4666_s3 + $0x190] sm:$0xff] }
 0x12e   : > { %v1819_v48 = vmax.f32 %v1810_v28, 0.0  ;;  %v1821_v49 = vmax.f32 %v1812_v31, 0.0  ;;  %v1811_v51 = vadd.f32 %v3680_v14, %v1796_v26  ;;  %v1813_v24 = vadd.f32 %v3680_v14, %v1798_v43  ;;  %2634 = vmatpush2.msra.mxu0 %v2427_v27  ;;  %v2411_v27 = vld [vmem:[%s4666_s3 + $0x170] sm:$0xff] }
 0x12f   : > { %2635 = vmatprep.subr.mxu0 %v2426_v44  ;;  %v1844_v28 = vlaneseq  ;;  %v2439_v44 = vld [vmem:[%s4666_s3 + $0x250] sm:$0xff] }
 0x130   : > { %1828 = vst [vmem:[#allocation3 + $0x8] sm:$0xff] %v1819_v48  ;;  %1830 = vst [vmem:[#allocation3 + $0x18] sm:$0xff] %v1821_v49  ;;  %v1820_v52 = vmax.f32 %v1811_v51, 0.0  ;;  %v1822_v54 = vmax.f32 %v1813_v24, 0.0  ;;  %2636 = vmatpush2.msra.mxu0 %v2425_v16  ;;  %v2451_v51 = vld [vmem:[%s4666_s3 + $0x2b0] sm:$0xff]  ;;  %v2422_v24 = vld [vmem:[%s4666_s3 + $0x1c8] sm:$0xff] }
 0x131   : > { %v1628_v59 = vpop.f32.mrf.mxu0  ;;  %v1699_v61 = vpop.f32.mrf.mxu1  ;;  %2637 = vmatprep.subr.mxu0 %v2424_v18  ;;  %vm3790_vm1 = vcmp.lt.s32.totalorder %v1844_v28, 144  ;;  %v2408_v16 = vld [vmem:[%s4666_s3 + $0x158] sm:$0xff]  ;;  %vm1859_vm2 = vcmp.ge.s32.totalorder %v1844_v28, 16  ;;  %vm1860_vm3 = vcmp.lt.s32.totalorder %v1844_v28, 160  ;;  %vm1873_vm9 = vcmp.ge.s32.totalorder %v1844_v28, 32 }
 0x132   : > { %1829 = vst [vmem:[#allocation3 + $0x10] sm:$0xff] %v1820_v52  ;;  %1831 = vst [vmem:[#allocation3 + $0x20] sm:$0xff] %v1822_v54  ;;  %v1790_v2 = vmax.f32 %v3655_v0, %v1628_v59  ;;  %v1792_v3 = vmax.f32 %v3689_v20, %v1699_v61  ;;  %v1784_v0 = vmax.f32 %v3582_v33, %v3647_v60  ;;  %v2455_v33 = vld [vmem:[%s4666_s3 + $0x2d0] sm:$0xff]  ;;  %v2454_v60 = vld [vmem:[%s4666_s3 + $0x2c8] sm:$0xff]  ;;  %vm1874_vm10 = vcmp.lt.s32.totalorder %v1844_v28, 176 }
 0x133   : > { %v1630_v5 = vpop.f32.mrf.mxu0  ;;  %v1701_v6 = vpop.f32.mrf.mxu1  ;;  %2677 = vmatpush1.msra.mxu1 %v2455_v33  ;;  %v2420_v54 = vld [vmem:[%s4666_s3 + $0x1b8] sm:$0xff]  ;;  %v2418_v59 = vld [vmem:[%s4666_s3 + $0x1a8] sm:$0xff]  ;;  %vm4079_vm5 = vmand %vm1859_vm2, %vm1860_vm3  ;;  %vm1888_vm14 = vcmp.ge.s32.totalorder %v1844_v28, 48  ;;  %vm1889_vm15 = vcmp.lt.s32.totalorder %v1844_v28, 192  ;;  %vm1903_vm2 = vcmp.ge.s32.totalorder %v1844_v28, 64  ;;  %vm1904_vm3 = vcmp.lt.s32.totalorder %v1844_v28, 208 }
 0x134   : > { %v1799_v8 = vmax.f32 %v1781_v58, %v1790_v2  ;;  %v1801_v9 = vmax.f32 %v1783_v63, %v1792_v3  ;;  %v1791_v10 = vmax.f32 %v3678_v13, %v1630_v5  ;;  %v1793_v11 = vmax.f32 %v3663_v4, %v1701_v6  ;;  %2678 = vmatprep.subr.mxu1 %v2454_v60  ;;  %v2446_v61 = vld [vmem:[%s4666_s3 + $0x288] sm:$0xff]  ;;  %v2445_v2 = vld [vmem:[%s4666_s3 + $0x280] sm:$0xff]  ;;  %v2416_v3 = vld [vmem:[%s4666_s3 + $0x198] sm:$0xff] }
 0x135   : > { %2679 = vmatpush1.msra.mxu1 %v2453_v17  ;;  %v2442_v6 = vld [vmem:[%s4666_s3 + $0x268] sm:$0xff]  ;;  %v2436_v18 = vld [vmem:[%s4666_s3 + $0x238] sm:$0xff]  ;;  %vm4102_vm12 = vmand %vm1873_vm9, %vm1874_vm10  ;;  %vm1918_vm9 = vcmp.ge.s32.totalorder %v1844_v28, 80  ;;  %vm1919_vm10 = vcmp.lt.s32.totalorder %v1844_v28, 224 }
 0x136   : > { %v1814_v4 = vadd.f32 %v3680_v14, %v1799_v8  ;;  %v1816_v12 = vadd.f32 %v3680_v14, %v1801_v9  ;;  %v1800_v13 = vmax.f32 %v1782_v53, %v1791_v10  ;;  %v1802_v15 = vmax.f32 %v1784_v0, %v1793_v11  ;;  %2680 = vmatprep.subr.mxu1 %v2452_v34  ;;  %v2443_v53 = vld [vmem:[%s4666_s3 + $0x270] sm:$0xff]  ;;  %v2414_v0 = vld [vmem:[%s4666_s3 + $0x188] sm:$0xff]  ;;  %v2441_v8 = vld [vmem:[%s4666_s3 + $0x260] sm:$0xff] }
 0x137   : > { %v1851_v20 = vld [vmem:[#allocation3 + $0x1] ss:$8 sm:$0x3]  ;;  %v1843_v49 = vld [vmem:[#allocation3] ss:$8 sm:$0x3]  ;;  %2681 = vmatpush1.msra.mxu1 %v2451_v51 }
 0x138   : > { %v1823_v21 = vmax.f32 %v1814_v4, 0.0  ;;  %v1825_v22 = vmax.f32 %v1816_v12, 0.0  ;;  %v1815_v23 = vadd.f32 %v3680_v14, %v1800_v13  ;;  %v1817_v25 = vadd.f32 %v3680_v14, %v1802_v15  ;;  %1853 = vrot.lane.b32.xlu0 %v1851_v20, %s3248_s14  ;;  %v2423_v14 = vld [vmem:[%s4666_s3 + $0x1d0] sm:$0xff]  ;;  %1848 = vst.msk [vmem:[#allocation4] ss:$8 sm:$0x3] %vm3790_vm1, %v1843_v49  ;;  %2682 = vmatprep.subr.mxu1 %v2450_v29 }
 0x139   : > { %v1986_v35 = vld [vmem:[#allocation3 + $0x10] ss:$8 sm:$0x3]  ;;  %2638 = vmatpush2.msra.mxu0 %v2423_v14  ;;  %v2058_v41 = vld [vmem:[#allocation3 + $0x19] ss:$8 sm:$0x3]  ;;  %2683 = vmatpush1.msra.mxu1 %v2449_v50 }
 0x13a   : > { %1832 = vst [vmem:[#allocation3 + $0x28] sm:$0xff] %v1823_v21  ;;  %1834 = vst [vmem:[#allocation3 + $0x38] sm:$0xff] %v1825_v22  ;;  %v1824_v36 = vmax.f32 %v1815_v23, 0.0  ;;  %v1826_v38 = vmax.f32 %v1817_v25, 0.0  ;;  %1988 = vrot.lane.b32.xlu1 %v1986_v35, %s4679_s17  ;;  %2639 = vmatprep.subr.mxu0 %v2422_v24  ;;  %v2412_v10 = vld [vmem:[%s4666_s3 + $0x178] sm:$0xff]  ;;  %v2410_v60 = vld [vmem:[%s4666_s3 + $0x168] sm:$0xff] }
 0x13b   : > { %v1925_v39 = vld [vmem:[#allocation3 + $0x8] ss:$8 sm:$0x3]  ;;  %v2047_v40 = vld [vmem:[#allocation3 + $0x18] ss:$8 sm:$0x3]  ;;  %2640 = vmatpush2.msra.mxu0 %v2421_v19  ;;  %2684 = vmatprep.subr.mxu1 %v2448_v55 }
 0x13c   : > { %1833 = vst [vmem:[#allocation3 + $0x30] sm:$0xff] %v1824_v36  ;;  %1835 = vst [vmem:[#allocation3 + $0x40] sm:$0xff] %v1826_v38  ;;  %1927 = vrot.lane.b32.xlu0 %v1925_v39, %s4675_s20  ;;  %v1998_v42 = vld [vmem:[#allocation3 + $0x11] ss:$8 sm:$0x3]  ;;  %2641 = vmatprep.subr.mxu0 %v2420_v54  ;;  %v2438_v4 = vld [vmem:[%s4666_s3 + $0x248] sm:$0xff] }
 0x13d   : > { %v1942_v63 = vld [vmem:[#allocation3 + $0xa] ss:$8 sm:$0x3]  ;;  %2642 = vmatpush2.msra.mxu0 %v2419_v56  ;;  %2685 = vmatpush1.msra.mxu1 %v2447_v57  ;;  %v2069_v9 = vld [vmem:[#allocation3 + $0x1a] ss:$8 sm:$0x3] }
 0x13e   : > { %2049 = vrot.lane.b32.xlu1 %v2047_v40, %s4671_s21  ;;  %2643 = vmatprep.subr.mxu0 %v2418_v59  ;;  %v1866_v37 = vld [vmem:[#allocation3 + $0x2] ss:$8 sm:$0x3]  ;;  %v2440_v11 = vld [vmem:[%s4666_s3 + $0x258] sm:$0xff]  ;;  %v2407_v20 = vld [vmem:[%s4666_s3 + $0x150] sm:$0xff] }
 0x13f   : > { %2686 = vmatprep.subr.mxu1 %v2446_v61  ;;  %2644 = vmatpush2.msra.mxu0 %v2417_v62  ;;  %v1880_v33 = vld [vmem:[#allocation3 + $0x3] ss:$8 sm:$0x3]  ;;  %v2014_v17 = vld [vmem:[#allocation3 + $0x13] ss:$8 sm:$0x3] }
 0x140   : > { %2060 = vrot.lane.b32.xlu0 %v2058_v41, %s4679_s17  ;;  %2687 = vmatpush1.msra.mxu1 %v2445_v2  ;;  %v1953_v12 = vld [vmem:[#allocation3 + $0xb] ss:$8 sm:$0x3]  ;;  %v2409_v13 = vld [vmem:[%s4666_s3 + $0x160] sm:$0xff]  ;;  %v2404_v38 = vld [vmem:[%s4666_s3 + $0x138] sm:$0xff] }
 0x141   : > { %v2107_v45 = vld [vmem:[#allocation3 + $0x20] ss:$8 sm:$0x3]  ;;  %v2118_v46 = vld [vmem:[#allocation3 + $0x21] ss:$8 sm:$0x3]  ;;  %2645 = vmatprep.subr.mxu0 %v2416_v3  ;;  %2688 = vmatprep.subr.mxu1 %v2444_v32 }
 0x142   : > { %2000 = vrot.lane.b32.xlu1 %v1998_v42, %s4675_s20  ;;  %v2129_v5 = vld [vmem:[#allocation3 + $0x22] ss:$8 sm:$0x3]  ;;  %2646 = vmatpush2.msra.mxu0 %v2415_v30  ;;  %v2435_v21 = vld [vmem:[%s4666_s3 + $0x230] sm:$0xff]  ;;  %v2432_v14 = vld [vmem:[%s4666_s3 + $0x218] sm:$0xff] }
 0x143   : > { %v2227_v47 = vld [vmem:[#allocation3 + $0x30] ss:$8 sm:$0x3]  ;;  %v2178_v26 = vld [vmem:[#allocation3 + $0x29] ss:$8 sm:$0x3]  ;;  %2689 = vmatpush1.msra.mxu1 %v2443_v53  ;;  %2647 = vmatprep.subr.mxu0 %v2414_v0 }
 0x144   : > { %2109 = vrot.lane.b32.xlu0 %v2107_v45, %s4673_s22  ;;  %v2167_v31 = vld [vmem:[#allocation3 + $0x28] ss:$8 sm:$0x3]  ;;  %v2293_v48 = vld [vmem:[#allocation3 + $0x38] ss:$8 sm:$0x3]  ;;  %2690 = vmatprep.subr.mxu1 %v2442_v6 }
 0x145   : > { %v2304_v52 = vld [vmem:[#allocation3 + $0x39] ss:$8 sm:$0x3]  ;;  %2648 = vmatpush2.msra.mxu0 %v2413_v7  ;;  %2691 = vmatpush1.msra.mxu1 %v2441_v8  ;;  %v2140_v22 = vld [vmem:[#allocation3 + $0x23] ss:$8 sm:$0x3] }
 0x146   : > { %2120 = vrot.lane.b32.xlu1 %v2118_v46, %s4671_s21  ;;  %v2238_v58 = vld [vmem:[#allocation3 + $0x31] ss:$8 sm:$0x3]  ;;  %s4685_s21 = smov 112   ;;  %2649 = vmatprep.subr.mxu0 %v2412_v10  ;;  %v2437_v15 = vld [vmem:[%s4666_s3 + $0x240] sm:$0xff]  ;;  %v2406_v23 = vld [vmem:[%s4666_s3 + $0x148] sm:$0xff] }
 0x147   : > { %2692 = vmatprep.subr.mxu1 %v2440_v11  ;;  %2650 = vmatpush2.msra.mxu0 %v2411_v27  ;;  %v2434_v25 = vld [vmem:[%s4666_s3 + $0x228] sm:$0xff]  ;;  %v2405_v34 = vld [vmem:[%s4666_s3 + $0x140] sm:$0xff]  ;;  %v2249_v35 = vld [vmem:[#allocation3 + $0x32] ss:$8 sm:$0x3] }
 0x148   : > { %2229 = vrot.lane.b32.xlu0 %v2227_v47, %s4677_s23  ;;  %2693 = vmatpush1.msra.mxu1 %v2439_v44  ;;  %v2433_v36 = vld [vmem:[%s4666_s3 + $0x220] sm:$0xff]  ;;  %v2189_v39 = vld [vmem:[#allocation3 + $0x2a] ss:$8 sm:$0x3]  ;;  %v2492_v49 = vld [vmem:[%s4666_s3 + $0x3f8] sm:$0xff] }
 0x149   : > { %2651 = vmatprep.subr.mxu0 %v2410_v60  ;;  %2694 = vmatprep.subr.mxu1 %v2438_v4  ;;  %v2403_v40 = vld [vmem:[%s4666_s3 + $0x130] sm:$0xff]  ;;  %v2402_v42 = vld [vmem:[%s4666_s3 + $0x128] sm:$0xff]  ;;  %v2401_v47 = vld [vmem:[%s4666_s3 + $0x120] sm:$0xff] }
 0x14a   : > { %2169 = vrot.lane.b32.xlu1 %v2167_v31, %s3254_s29  ;;  %2652 = vmatpush2.msra.mxu0 %v2409_v13  ;;  %v2431_v41 = vld [vmem:[%s4666_s3 + $0x210] sm:$0xff]  ;;  %v2430_v46 = vld [vmem:[%s4666_s3 + $0x208] sm:$0xff]  ;;  %v2429_v31 = vld [vmem:[%s4666_s3 + $0x200] sm:$0xff] }
 0x14b   : > { %2695 = vmatpush1.msra.mxu1 %v2437_v15  ;;  %2653 = vmatprep.subr.mxu0 %v2408_v16  ;;  %v2200_v45 = vld [vmem:[#allocation3 + $0x2b] ss:$8 sm:$0x3]  ;;  %v2326_v24 = vld [vmem:[#allocation3 + $0x3b] ss:$8 sm:$0x3] }
 0x14c   : > { %2180 = vrot.lane.b32.xlu0 %v2178_v26, %s4673_s22  ;;  %2696 = vmatprep.subr.mxu1 %v2436_v18  ;;  %v2315_v26 = vld [vmem:[#allocation3 + $0x3a] ss:$8 sm:$0x3]  ;;  %v2399_v51 = vld [vmem:[%s4666_s3 + $0x110] sm:$0xff]  ;;  %v2398_v19 = vld [vmem:[%s4666_s3 + $0x108] sm:$0xff] }
 0x14d   : > { %2654 = vmatpush2.msra.mxu0 %v2407_v20  ;;  %2697 = vmatpush1.msra.mxu1 %v2435_v21  ;;  %v2491_v29 = vld [vmem:[%s4666_s3 + $0x3f0] sm:$0xff]  ;;  %v2490_v50 = vld [vmem:[%s4666_s3 + $0x3e8] sm:$0xff]  ;;  %v2397_v54 = vld [vmem:[%s4666_s3 + $0x100] sm:$0xff] }
 0x14e   : > { %2295 = vrot.lane.b32.xlu1 %v2293_v48, %s3248_s14  ;;  %2655 = vmatprep.subr.mxu0 %v2406_v23  ;;  %v2400_v48 = vld [vmem:[%s4666_s3 + $0x118] sm:$0xff]  ;;  %v2489_v55 = vld [vmem:[%s4666_s3 + $0x3e0] sm:$0xff]  ;;  %v1964_v57 = vld [vmem:[#allocation3 + $0xc] ss:$8 sm:$0x3] }
 0x14f   : > { %2698 = vmatprep.subr.mxu1 %v2434_v25  ;;  %2656 = vmatpush2.msra.mxu0 %v2405_v34  ;;  %v2524_v56 = vld [vmem:[%s4666_s3 + $0x4f8] sm:$0xff]  ;;  %v2487_v59 = vld [vmem:[%s4666_s3 + $0x3d0] sm:$0xff]  ;;  %v1895_v61 = vld [vmem:[#allocation3 + $0x4] ss:$8 sm:$0x3] }
 0x150   : > { %2306 = vrot.lane.b32.xlu0 %v2304_v52, %s4677_s23  ;;  %2699 = vmatpush1.msra.mxu1 %v2433_v36  ;;  %v2260_v52 = vld [vmem:[#allocation3 + $0x33] ss:$8 sm:$0x3]  ;;  %v2486_v62 = vld [vmem:[%s4666_s3 + $0x3c8] sm:$0xff]  ;;  %v2481_v53 = vld [vmem:[%s4666_s3 + $0x3a0] sm:$0xff] }
 0x151   : > { %2657 = vmatprep.subr.mxu0 %v2404_v38  ;;  %2700 = vmatprep.subr.mxu1 %v2432_v14  ;;  %v2085_v2 = vld [vmem:[#allocation3 + $0x1c] ss:$8 sm:$0x3]  ;;  %v2483_v32 = vld [vmem:[%s4666_s3 + $0x3b0] sm:$0xff]  ;;  %v2482_v30 = vld [vmem:[%s4666_s3 + $0x3a8] sm:$0xff] }
 0x152   : > { %2240 = vrot.lane.b32.xlu1 %v2238_v58, %s3254_s29  ;;  %2658 = vmatpush2.msra.mxu0 %v2403_v40  ;;  %v2488_v58 = vld [vmem:[%s4666_s3 + $0x3d8] sm:$0xff]  ;;  %v1910_v0 = vld [vmem:[#allocation3 + $0x5] ss:$8 sm:$0x3]  ;;  %v2479_v6 = vld [vmem:[%s4666_s3 + $0x390] sm:$0xff] }
 0x153   : > { %2701 = vmatpush1.msra.mxu1 %v2431_v41  ;;  %2659 = vmatprep.subr.mxu0 %v2402_v42  ;;  %v2484_v3 = vld [vmem:[%s4666_s3 + $0x3b8] sm:$0xff]  ;;  %v1975_v7 = vld [vmem:[#allocation3 + $0xd] ss:$8 sm:$0x3]  ;;  %v2473_v60 = vld [vmem:[%s4666_s3 + $0x360] sm:$0xff] }
 0x154   : > { %1944 = vrot.lane.b32.xlu0 %v1942_v63, %s3248_s14  ;;  %2702 = vmatprep.subr.mxu1 %v2430_v46  ;;  %v2485_v63 = vld [vmem:[%s4666_s3 + $0x3c0] sm:$0xff]  ;;  %v2478_v8 = vld [vmem:[%s4666_s3 + $0x388] sm:$0xff]  ;;  %v2036_v10 = vld [vmem:[#allocation3 + $0x15] ss:$8 sm:$0x3] }
 0x155   : > { %2660 = vmatpush2.msra.mxu0 %v2401_v47  ;;  %2703 = vmatpush1.msra.mxu1 %v2429_v31  ;;  %v2476_v11 = vld [vmem:[%s4666_s3 + $0x378] sm:$0xff]  ;;  %v2475_v27 = vld [vmem:[%s4666_s3 + $0x370] sm:$0xff]  ;;  %v2474_v44 = vld [vmem:[%s4666_s3 + $0x368] sm:$0xff] }
 0x156   : > { %1868 = vrot.lane.b32.xlu1 %v1866_v37, %s4677_s23  ;;  %2661 = vmatprep.subr.mxu0 %v2400_v48  ;;  %v2025_v37 = vld [vmem:[#allocation3 + $0x14] ss:$8 sm:$0x3]  ;;  %v2156_v4 = vld [vmem:[#allocation3 + $0x25] ss:$8 sm:$0x3] }
 0x157   : > { %2704 = vmatprep.subr.mxu1 %v2492_v49  ;;  %2662 = vmatpush2.msra.mxu0 %v2399_v51  ;;  %v2471_v13 = vld [vmem:[%s4666_s3 + $0x350] sm:$0xff]  ;;  %v2470_v16 = vld [vmem:[%s4666_s3 + $0x348] sm:$0xff]  ;;  %v2468_v20 = vld [vmem:[%s4666_s3 + $0x338] sm:$0xff] }
 0x158   : > { %2131 = vrot.lane.b32.xlu0 %v2129_v5, %s4679_s17  ;;  %2705 = vmatpush2.msra.mxu1 %v2491_v29  ;;  %v2480_v5 = vld [vmem:[%s4666_s3 + $0x398] sm:$0xff]  ;;  %v2211_v15 = vld [vmem:[#allocation3 + $0x2c] ss:$8 sm:$0x3]  ;;  %v2465_v25 = vld [vmem:[%s4666_s3 + $0x320] sm:$0xff] }
 0x159   : > { %2663 = vmatprep.subr.mxu0 %v2398_v19  ;;  %2706 = vmatprep.subr.mxu1 %v2490_v50  ;;  %v2271_v18 = vld [vmem:[#allocation3 + $0x34] ss:$8 sm:$0x3]  ;;  %v2466_v23 = vld [vmem:[%s4666_s3 + $0x328] sm:$0xff] }
 0x15a   : > { %2071 = vrot.lane.b32.xlu1 %v2069_v9, %s4685_s21  ;;  %2664 = vmatpush2.msra.mxu0 %v2397_v54  ;;  %v2477_v9 = vld [vmem:[%s4666_s3 + $0x380] sm:$0xff]  ;;  %v2467_v21 = vld [vmem:[%s4666_s3 + $0x330] sm:$0xff]  ;;  %v2462_v14 = vld [vmem:[%s4666_s3 + $0x308] sm:$0xff] }
 0x15b   : > { %2707 = vmatpush2.msra.mxu1 %v2489_v55  ;;  %2743 = vmatprep.subr.mxu0 %v2524_v56  ;;  %v2348_v34 = vld [vmem:[#allocation3 + $0x3d] ss:$8 sm:$0x3]  ;;  %v2463_v36 = vld [vmem:[%s4666_s3 + $0x310] sm:$0xff] }
 0x15c   : > { %1882 = vrot.lane.b32.xlu0 %v1880_v33, %s3254_s29  ;;  %2708 = vmatprep.subr.mxu1 %v2488_v58  ;;  %v2096_v33 = vld [vmem:[#allocation3 + $0x1d] ss:$8 sm:$0x3]  ;;  %v1937_v50 = vld [vmem:[#allocation3 + $0x9] ss:$8 sm:$0x3] }
 0x15d   : > { %2709 = vmatpush2.msra.mxu1 %v2487_v59  ;;  %v2282_v38 = vld [vmem:[#allocation3 + $0x35] ss:$8 sm:$0x3] }
 0x15e   : > { %1955 = vrot.lane.b32.xlu1 %v1953_v12, %s4677_s23  ;;  %2710 = vmatprep.subr.mxu1 %v2486_v62  ;;  %v2472_v12 = vld [vmem:[%s4666_s3 + $0x358] sm:$0xff] }
 0x15f   : > { %2711 = vmatpush2.msra.mxu1 %v2485_v63  ;;  %v2588_v40 = vld [vmem:[%s4666_s3 + $0x6f8] sm:$0xff] }
 0x160   : > { %2016 = vrot.lane.b32.xlu0 %v2014_v17, %s3248_s14  ;;  %2712 = vmatprep.subr.mxu1 %v2484_v3  ;;  %v2469_v17 = vld [vmem:[%s4666_s3 + $0x340] sm:$0xff] }
 0x161   : > { %2713 = vmatpush2.msra.mxu1 %v2483_v32 }
 0x162   : > { %2142 = vrot.lane.b32.xlu1 %v2140_v22, %s4685_s21  ;;  %2714 = vmatprep.subr.mxu1 %v2482_v30  ;;  %v2337_v22 = vld [vmem:[#allocation3 + $0x3c] ss:$8 sm:$0x3] }
 0x163   : > { %2715 = vmatpush2.msra.mxu1 %v2481_v53 }
 0x164   : > { %2251 = vrot.lane.b32.xlu0 %v2249_v35, %s4686_s8  ;;  %2716 = vmatprep.subr.mxu1 %v2480_v5  ;;  %v2464_v35 = vld [vmem:[%s4666_s3 + $0x318] sm:$0xff] }
 0x165   : > { %2717 = vmatpush2.msra.mxu1 %v2479_v6 }
 0x166   : > { %2191 = vrot.lane.b32.xlu1 %v2189_v39, %s4687_s18  ;;  %2718 = vmatprep.subr.mxu1 %v2478_v8  ;;  %v2461_v39 = vld [vmem:[%s4666_s3 + $0x300] sm:$0xff] }
 0x167   : > { %2719 = vmatpush2.msra.mxu1 %v2477_v9 }
 0x168   : > { %2202 = vrot.lane.b32.xlu0 %v2200_v45, %s4679_s17  ;;  %2720 = vmatprep.subr.mxu1 %v2476_v11 }
 0x169   : > { %2721 = vmatpush2.msra.mxu1 %v2475_v27 }
 0x16a   : > { %2317 = vrot.lane.b32.xlu1 %v2315_v26, %s3254_s29  ;;  %2722 = vmatprep.subr.mxu1 %v2474_v44 }
 0x16b   : > { %2723 = vmatpush2.msra.mxu1 %v2473_v60 }
 0x16c   : > { %2328 = vrot.lane.b32.xlu0 %v2326_v24, %s4686_s8  ;;  %2724 = vmatprep.subr.mxu1 %v2472_v12 }
 0x16d   : > { %2725 = vmatpush2.msra.mxu1 %v2471_v13 }
 0x16e   : > { %2262 = vrot.lane.b32.xlu1 %v2260_v52, %s4687_s18  ;;  %2726 = vmatprep.subr.mxu1 %v2470_v16 }
 0x16f   : > { %2727 = vmatpush2.msra.mxu1 %v2469_v17 }
 0x170   : > { %1966 = vrot.lane.b32.xlu0 %v1964_v57, %s3254_s29  ;;  %2728 = vmatprep.subr.mxu1 %v2468_v20 }
 0x171   : > { %2729 = vmatpush2.msra.mxu1 %v2467_v21 }
 0x172   : > { %1897 = vrot.lane.b32.xlu1 %v1895_v61, %s4686_s8  ;;  %2730 = vmatprep.subr.mxu1 %v2466_v23 }
 0x173   : > { %2731 = vmatpush2.msra.mxu1 %v2465_v25 }
 0x174   : > { %2087 = vrot.lane.b32.xlu0 %v2085_v2, %s3248_s14  ;;  %2732 = vmatprep.subr.mxu1 %v2464_v35  ;;  %v2009_v2 = vld [vmem:[#allocation3 + $0x12] ss:$8 sm:$0x3] }
 0x175   : > { %2733 = vmatpush2.msra.mxu1 %v2463_v36 }
 0x176   : > { %2027 = vrot.lane.b32.xlu1 %v2025_v37, %s4688_s9  ;;  %2734 = vmatprep.subr.mxu1 %v2462_v14 }
 0x177   : > { %2735 = vmatpush2.msra.mxu1 %v2461_v39 }
 0x178   : > { %1912 = vrot.lane.b32.xlu0 %v1910_v0, %s4687_s18  ;;  %2814 = vmatprep.subr.mxu1 %v2588_v40 }
 0x17a   : > { %1977 = vrot.lane.b32.xlu1 %v1975_v7, %s4686_s8  ;;  %s3096_s8 = sshll.u32 %s3317_s28, 7 }
 0x17c   : > { %2038 = vrot.lane.b32.xlu0 %v2036_v10, %s3254_s29  ;;  %s3009_s29 = scalar_lea.hbm %s4670_s7, %s3096_s8 }
 0x17e   : > { %2098 = vrot.lane.b32.xlu1 %v2096_v33, %s4688_s9  ;;  %s3074_s9 = sshll.u32 %s269_s13, 3 }
 0x180   : > { %2158 = vrot.lane.b32.xlu0 %v2156_v4, %s3248_s14  ;;  %s271_s14 = scalar_lea.vmem [#allocation5], %s3074_s9 }
 0x182   : > { %2213 = vrot.lane.b32.xlu1 %v2211_v15, %s4685_s21 }
 0x184   : > { %2273 = vrot.lane.b32.xlu0 %v2271_v18, %s4689_s19 }
 0x186   : > { %2339 = vrot.lane.b32.xlu1 %v2337_v22, %s4687_s18  ;;  %s3011_s18 = sshll.u32 %s271_s14, 4  ;;  %s3012_s18 = int_to_ptr.vmem [resolvable:$true] %s3011_s18 }
 0x187   : > { %s3184_s20 = scalar_lea.vmem %s3012_s18, 128 }
 0x188   : > { %2350 = vrot.lane.b32.xlu0 %v2348_v34, %s4689_s19  ;;  %s2998_s19 = scalar_lea.sflag [#allocation6], %s269_s13  ;;  %p3185_p11 = scmp.ne.s32.totalorder %s3012_s18, %s3184_s20 }
 0x18a   : > { %2284 = vrot.lane.b32.xlu1 %v2282_v38, %s4685_s21  ;;  %p3186_p12 = pnand %p3185_p11, %p3334_p5  ;;  %s3255_s21 = smov [#allocation5]  }
 0x18b   : > { %s3188_s22 = sshll.u32 %s3255_s21, 4  ;;  %s3189_s22 = int_to_ptr.vmem [resolvable:$false] %s3188_s22 }
 0x18c   : > { %p3187_p13 = pneg %p3186_p12  ;;  %s3190_s28 = scalar_lea.vmem %s3189_s22, 256 }
 0x18d   : > { %p3191_p0 = scmp.lt.s32.totalorder %s3012_s18, %s3189_s22  ;;  %p3192_p1 = scmp.lt.s32.totalorder %s3190_s28, %s3184_s20 }
 0x18f   : > { %p3193_p2 = por %p3192_p1, %p3191_p0 }
 0x191   : > { %p3194_p3 = pnand %p3193_p2, %p3187_p13 }
 0x1aa   : > { %v1854_v41 = vpop.permute.xlu0 %1853 }
 0x1ab   : > { %v1855_v45 = vrot.slane %v1854_v41, 7 }
 0x1ac   : > { %v1989_v46 = vpop.permute.xlu1 %1988 }
 0x1ad   : > { %v1857_v47 = vsel %vm1856_vm4, %v1855_v45, %v1854_v41  ;;  %v1990_v31 = vrot.slane %v1989_v46, 1  ;;  %v2523_v41 = vld [vmem:[%s4666_s3 + $0x4f0] sm:$0xff] }
 0x1ae   : > { %1863 = vst.msk [vmem:[#allocation4 + $0x8] ss:$8 sm:$0x3] %vm4079_vm5, %v1857_v47  ;;  %v1928_v26 = vpop.permute.xlu0 %1927  ;;  %v2080_v47 = vld [vmem:[#allocation3 + $0x1b] ss:$8 sm:$0x3] }
 0x1af   : > { %v1992_v48 = vsel %vm1991_vm6, %v1989_v46, %v1990_v31  ;;  %v1929_v49 = vrot.slane %v1928_v26, 1  ;;  %v2522_v46 = vld [vmem:[%s4666_s3 + $0x4e8] sm:$0xff] }
 0x1b0   : > { %1995 = vst.msk [vmem:[#allocation4 + $0x2] ss:$8 sm:$0x3] %vm3790_vm1, %v1992_v48  ;;  %v2050_v51 = vpop.permute.xlu1 %2049  ;;  %v2521_v48 = vld [vmem:[%s4666_s3 + $0x4e0] sm:$0xff] }
 0x1b1   : > { %v1931_v24 = vsel %vm1930_vm7, %v1928_v26, %v1929_v49  ;;  %v2051_v29 = vrot.slane %v2050_v51, 1 }
 0x1b2   : > { %1934 = vst.msk [vmem:[#allocation4 + $0x1] ss:$8 sm:$0x3] %vm3790_vm1, %v1931_v24  ;;  %v2061_v19 = vpop.permute.xlu0 %2060 }
 0x1b3   : > { %v2052_v52 = vsel %vm1915_vm8, %v2050_v51, %v2051_v29  ;;  %v2062_v54 = vrot.slane %v2061_v19, 1  ;;  %1939 = vst.msk [vmem:[#allocation4 + $0x9] ss:$8 sm:$0x3] %vm4079_vm5, %v1937_v50  ;;  %v2520_v51 = vld [vmem:[%s4666_s3 + $0x4d8] sm:$0xff] }
 0x1b4   : > { %2055 = vst.msk [vmem:[#allocation4 + $0x3] ss:$8 sm:$0x3] %vm3790_vm1, %v2052_v52  ;;  %v2001_v55 = vpop.permute.xlu1 %2000  ;;  %v2518_v52 = vld [vmem:[%s4666_s3 + $0x4c8] sm:$0xff] }
 0x1b5   : > { %v2063_v56 = vsel %vm1991_vm6, %v2061_v19, %v2062_v54  ;;  %v2002_v57 = vrot.slane %v2001_v55, 1  ;;  %v2519_v19 = vld [vmem:[%s4666_s3 + $0x4d0] sm:$0xff] }
 0x1b6   : > { %2066 = vst.msk [vmem:[#allocation4 + $0xb] ss:$8 sm:$0x3] %vm4079_vm5, %v2063_v56  ;;  %v2110_v58 = vpop.permute.xlu0 %2109  ;;  %v2517_v56 = vld [vmem:[%s4666_s3 + $0x4c0] sm:$0xff] }
 0x1b7   : > { %v2003_v61 = vsel %vm1930_vm7, %v2001_v55, %v2002_v57  ;;  %v2111_v62 = vrot.slane %v2110_v58, 1 }
 0x1b8   : > { %2006 = vst.msk [vmem:[#allocation4 + $0xa] ss:$8 sm:$0x3] %vm4079_vm5, %v2003_v61  ;;  %v2121_v63 = vpop.permute.xlu1 %2120  ;;  %v2541_v61 = vld [vmem:[%s4666_s3 + $0x580] sm:$0xff] }
 0x1b9   : > { %v2112_v3 = vsel %vm1900_vm11, %v2110_v58, %v2111_v62  ;;  %v2122_v32 = vrot.slane %v2121_v63, 1  ;;  %2011 = vst.msk [vmem:[#allocation4 + $0x12] ss:$8 sm:$0x3] %vm4102_vm12, %v2009_v2  ;;  %v2516_v58 = vld [vmem:[%s4666_s3 + $0x4b8] sm:$0xff]  ;;  %v2515_v2 = vld [vmem:[%s4666_s3 + $0x4b0] sm:$0xff] }
 0x1ba   : > { %2115 = vst.msk [vmem:[#allocation4 + $0x4] ss:$8 sm:$0x3] %vm3790_vm1, %v2112_v3  ;;  %v2230_v37 = vpop.permute.xlu0 %2229 }
 0x1bb   : > { %v2123_v30 = vsel %vm1915_vm8, %v2121_v63, %v2122_v32  ;;  %v2231_v53 = vrot.slane %v2230_v37, 1  ;;  %v2514_v32 = vld [vmem:[%s4666_s3 + $0x4a8] sm:$0xff] }
 0x1bc   : > { %2126 = vst.msk [vmem:[#allocation4 + $0xc] ss:$8 sm:$0x3] %vm4079_vm5, %v2123_v30  ;;  %v2170_v0 = vpop.permute.xlu1 %2169 }
 0x1bd   : > { %v2232_v5 = vsel %vm422_vm0, %v2230_v37, %v2231_v53  ;;  %v2171_v6 = vrot.slane %v2170_v0, 1  ;;  %v2151_v37 = vld [vmem:[#allocation3 + $0x24] ss:$8 sm:$0x3] }
 0x1be   : > { %2235 = vst.msk [vmem:[#allocation4 + $0x6] ss:$8 sm:$0x3] %vm3790_vm1, %v2232_v5  ;;  %v2181_v7 = vpop.permute.xlu0 %2180 }
 0x1bf   : > { %v2172_v8 = vsel %vm1885_vm13, %v2170_v0, %v2171_v6  ;;  %v2182_v9 = vrot.slane %v2181_v7, 1  ;;  %v2513_v0 = vld [vmem:[%s4666_s3 + $0x4a0] sm:$0xff]  ;;  %v2512_v6 = vld [vmem:[%s4666_s3 + $0x498] sm:$0xff] }
 0x1c0   : > { %2175 = vst.msk [vmem:[#allocation4 + $0x5] ss:$8 sm:$0x3] %vm3790_vm1, %v2172_v8  ;;  %v2296_v10 = vpop.permute.xlu1 %2295 }
 0x1c1   : > { %v2183_v11 = vsel %vm1900_vm11, %v2181_v7, %v2182_v9  ;;  %v2297_v27 = vrot.slane %v2296_v10, 1  ;;  %v2511_v9 = vld [vmem:[%s4666_s3 + $0x490] sm:$0xff] }
 0x1c2   : > { %2186 = vst.msk [vmem:[#allocation4 + $0xd] ss:$8 sm:$0x3] %vm4079_vm5, %v2183_v11  ;;  %v2307_v33 = vpop.permute.xlu0 %2306  ;;  %v2510_v11 = vld [vmem:[%s4666_s3 + $0x488] sm:$0xff] }
 0x1c3   : > { %v2298_v44 = vsel %vm1856_vm4, %v2296_v10, %v2297_v27  ;;  %v2308_v60 = vrot.slane %v2307_v33, 1 }
 0x1c4   : > { %2301 = vst.msk [vmem:[#allocation4 + $0x7] ss:$8 sm:$0x3] %vm3790_vm1, %v2298_v44  ;;  %v2241_v4 = vpop.permute.xlu1 %2240  ;;  %vm4146_vm1 = vmand %vm1888_vm14, %vm1889_vm15  ;;  %v2509_v44 = vld [vmem:[%s4666_s3 + $0x480] sm:$0xff] }
 0x1c5   : > { %v2309_v12 = vsel %vm422_vm0, %v2307_v33, %v2308_v60  ;;  %v2242_v13 = vrot.slane %v2241_v4, 1 }
 0x1c6   : > { %2312 = vst.msk [vmem:[#allocation4 + $0xf] ss:$8 sm:$0x3] %vm4079_vm5, %v2309_v12  ;;  %v1945_v15 = vpop.permute.xlu0 %1944 }
 0x1c7   : > { %v2243_v16 = vsel %vm1885_vm13, %v2241_v4, %v2242_v13  ;;  %v1946_v17 = vrot.slane %v1945_v15, 7  ;;  %v2508_v4 = vld [vmem:[%s4666_s3 + $0x478] sm:$0xff] }
 0x1c8   : > { %2246 = vst.msk [vmem:[#allocation4 + $0xe] ss:$8 sm:$0x3] %vm4079_vm5, %v2243_v16  ;;  %v1869_v18 = vpop.permute.xlu1 %1868  ;;  %vm4190_vm5 = vmand %vm1903_vm2, %vm1904_vm3 }
 0x1c9   : > { %v1947_v20 = vsel %vm1856_vm4, %v1946_v17, %v1945_v15  ;;  %v1870_v21 = vrot.slane %v1869_v18, 7  ;;  %v2507_v15 = vld [vmem:[%s4666_s3 + $0x470] sm:$0xff]  ;;  %v2506_v17 = vld [vmem:[%s4666_s3 + $0x468] sm:$0xff] }
 0x1ca   : > { %1950 = vst.msk [vmem:[#allocation4 + $0x11] ss:$8 sm:$0x3] %vm4102_vm12, %v1947_v20  ;;  %v2132_v43 = vpop.permute.xlu0 %2131 }
 0x1cb   : > { %v1871_v22 = vsel %vm422_vm0, %v1870_v21, %v1869_v18  ;;  %v2133_v23 = vrot.slane %v2132_v43, 1  ;;  %v2358_v45 = vld [vmem:[#allocation4] sm:$0xff]  ;;  %v2505_v21 = vld [vmem:[%s4666_s3 + $0x460] sm:$0xff] }
 0x1cc   : > { %1877 = vst.msk [vmem:[#allocation4 + $0x10] ss:$8 sm:$0x3] %vm4102_vm12, %v1871_v22  ;;  %v2072_v25 = vpop.permute.xlu1 %2071 }
 0x1cd   : > { %v2134_v34 = vsel %vm1991_vm6, %v2132_v43, %v2133_v23  ;;  %v2073_v35 = vrot.slane %v2072_v25, 1  ;;  %v2504_v43 = vld [vmem:[%s4666_s3 + $0x458] sm:$0xff] }
 0x1ce   : > { %2137 = vst.msk [vmem:[#allocation4 + $0x14] ss:$8 sm:$0x3] %vm4102_vm12, %v2134_v34  ;;  %v1883_v38 = vpop.permute.xlu0 %1882 }
 0x1cf   : > { %v2074_v14 = vsel %vm1930_vm7, %v2072_v25, %v2073_v35  ;;  %v1884_v39 = vrot.slane %v1883_v38, 7  ;;  %v2359_v40 = vld [vmem:[#allocation4 + $0x8] sm:$0xff]  ;;  %v2502_v35 = vld [vmem:[%s4666_s3 + $0x448] sm:$0xff] }
 0x1d0   : > { %2077 = vst.msk [vmem:[#allocation4 + $0x13] ss:$8 sm:$0x3] %vm4102_vm12, %v2074_v14  ;;  %2665 = vmatprep.mubr.f32.mxu0 %v2359_v40  ;;  %v1956_v42 = vpop.permute.xlu1 %1955  ;;  %v2503_v25 = vld [vmem:[%s4666_s3 + $0x450] sm:$0xff]  ;;  %v2500_v40 = vld [vmem:[%s4666_s3 + $0x438] sm:$0xff] }
 0x1d1   : > { %v1886_v31 = vsel %vm1885_vm13, %v1884_v39, %v1883_v38  ;;  %v1957_v26 = vrot.slane %v1956_v42, 7  ;;  %2666 = vmatmul.mubr.f32.vlgmr.msra.gmra.mxu0 %v2358_v45  ;;  %2082 = vst.msk [vmem:[#allocation4 + $0x1b] ss:$8 sm:$0x3] %vm4146_vm1, %v2080_v47  ;;  %v2501_v39 = vld [vmem:[%s4666_s3 + $0x440] sm:$0xff]  ;;  %v2499_v45 = vld [vmem:[%s4666_s3 + $0x430] sm:$0xff] }
 0x1d2   : > { %1892 = vst.msk [vmem:[#allocation4 + $0x18] ss:$8 sm:$0x3] %vm4146_vm1, %v1886_v31  ;;  %2744 = vmatpush1.msra.mxu0 %v2523_v41  ;;  %v2017_v49 = vpop.permute.xlu0 %2016  ;;  %v2498_v47 = vld [vmem:[%s4666_s3 + $0x428] sm:$0xff] }
 0x1d3   : > { %v1958_v24 = vsel %vm422_vm0, %v1957_v26, %v1956_v42  ;;  %v2018_v29 = vrot.slane %v2017_v49, 7  ;;  %2745 = vmatprep.subr.mxu0 %v2522_v46 }
 0x1d4   : > { %1961 = vst.msk [vmem:[#allocation4 + $0x19] ss:$8 sm:$0x3] %vm4146_vm1, %v1958_v24  ;;  %2746 = vmatpush1.msra.mxu0 %v2521_v48  ;;  %v2143_v50 = vpop.permute.xlu1 %2142  ;;  %v2497_v48 = vld [vmem:[%s4666_s3 + $0x420] sm:$0xff]  ;;  %v2496_v24 = vld [vmem:[%s4666_s3 + $0x418] sm:$0xff] }
 0x1d5   : > { %v2019_v54 = vsel %vm1856_vm4, %v2018_v29, %v2017_v49  ;;  %2747 = vmatprep.subr.mxu0 %v2520_v51  ;;  %v2144_v55 = vrot.slane %v2143_v50, 1  ;;  %v2565_v49 = vld [vmem:[%s4666_s3 + $0x640] sm:$0xff] }
 0x1d6   : > { %2022 = vst.msk [vmem:[#allocation4 + $0x1a] ss:$8 sm:$0x3] %vm4146_vm1, %v2019_v54  ;;  %2748 = vmatpush1.msra.mxu0 %v2519_v19  ;;  %v2252_v57 = vpop.permute.xlu0 %2251  ;;  %v2587_v54 = vld [vmem:[%s4666_s3 + $0x6f0] sm:$0xff] }
 0x1d7   : > { %v2145_v62 = vsel %vm1930_vm7, %v2143_v50, %v2144_v55  ;;  %v2253_v63 = vrot.slane %v2252_v57, 1  ;;  %2749 = vmatprep.subr.mxu0 %v2518_v52  ;;  %v2495_v52 = vld [vmem:[%s4666_s3 + $0x410] sm:$0xff] }
 0x1d8   : > { %2148 = vst.msk [vmem:[#allocation4 + $0x1c] ss:$8 sm:$0x3] %vm4146_vm1, %v2145_v62  ;;  %2750 = vmatpush1.msra.mxu0 %v2517_v56  ;;  %v2192_v3 = vpop.permute.xlu1 %2191 }
 0x1d9   : > { %v2254_v30 = vsel %vm1900_vm11, %v2252_v57, %v2253_v63  ;;  %2751 = vmatprep.subr.mxu0 %v2516_v58  ;;  %v2193_v53 = vrot.slane %v2192_v3, 1  ;;  %2153 = vst.msk [vmem:[#allocation4 + $0x24] ss:$8 sm:$0x3] %vm4190_vm5, %v2151_v37  ;;  %v2494_v57 = vld [vmem:[%s4666_s3 + $0x408] sm:$0xff]  ;;  %v2556_v37 = vld [vmem:[%s4666_s3 + $0x5f8] sm:$0xff] }
 0x1da   : > { %2257 = vst.msk [vmem:[#allocation4 + $0x16] ss:$8 sm:$0x3] %vm4102_vm12, %v2254_v30  ;;  %2752 = vmatpush1.msra.mxu0 %v2515_v2  ;;  %v2203_v5 = vpop.permute.xlu0 %2202  ;;  %v2586_v58 = vld [vmem:[%s4666_s3 + $0x6e8] sm:$0xff]  ;;  %v2493_v2 = vld [vmem:[%s4666_s3 + $0x400] sm:$0xff]  ;;  %v2584_v30 = vld [vmem:[%s4666_s3 + $0x6d8] sm:$0xff] }
 0x1db   : > { %v2194_v7 = vsel %vm1915_vm8, %v2192_v3, %v2193_v53  ;;  %v2204_v8 = vrot.slane %v2203_v5, 1  ;;  %2753 = vmatprep.subr.mxu0 %v2514_v32  ;;  %v2585_v3 = vld [vmem:[%s4666_s3 + $0x6e0] sm:$0xff] }
 0x1dc   : > { %2197 = vst.msk [vmem:[#allocation4 + $0x15] ss:$8 sm:$0x3] %vm4102_vm12, %v2194_v7  ;;  %2754 = vmatpush1.msra.mxu0 %v2513_v0  ;;  %v2318_v10 = vpop.permute.xlu1 %2317 }
 0x1dd   : > { %v2205_v27 = vsel %vm1991_vm6, %v2203_v5, %v2204_v8  ;;  %2755 = vmatprep.subr.mxu0 %v2512_v6  ;;  %v2319_v33 = vrot.slane %v2318_v10, 1  ;;  %v2555_v5 = vld [vmem:[%s4666_s3 + $0x5f0] sm:$0xff]  ;;  %v2554_v8 = vld [vmem:[%s4666_s3 + $0x5e8] sm:$0xff] }
 0x1de   : > { %2208 = vst.msk [vmem:[#allocation4 + $0x1d] ss:$8 sm:$0x3] %vm4146_vm1, %v2205_v27  ;;  %2756 = vmatpush1.msra.mxu0 %v2511_v9  ;;  %v2329_v60 = vpop.permute.xlu0 %2328  ;;  %v2583_v6 = vld [vmem:[%s4666_s3 + $0x6d0] sm:$0xff]  ;;  %v2582_v9 = vld [vmem:[%s4666_s3 + $0x6c8] sm:$0xff]  ;;  %v2553_v27 = vld [vmem:[%s4666_s3 + $0x5e0] sm:$0xff] }
 0x1df   : > { %v2320_v12 = vsel %vm1885_vm13, %v2318_v10, %v2319_v33  ;;  %v2330_v13 = vrot.slane %v2329_v60, 1  ;;  %2757 = vmatprep.subr.mxu0 %v2510_v11  ;;  %v2581_v33 = vld [vmem:[%s4666_s3 + $0x6c0] sm:$0xff] }
 0x1e0   : > { %2323 = vst.msk [vmem:[#allocation4 + $0x17] ss:$8 sm:$0x3] %vm4102_vm12, %v2320_v12  ;;  %2758 = vmatpush1.msra.mxu0 %v2509_v44  ;;  %v2263_v16 = vpop.permute.xlu1 %2262  ;;  %vm4285_vm12 = vmand %vm1918_vm9, %vm1919_vm10 }
 0x1e1   : > { %v2331_v18 = vsel %vm1900_vm11, %v2329_v60, %v2330_v13  ;;  %2759 = vmatprep.subr.mxu0 %v2508_v4  ;;  %v2264_v20 = vrot.slane %v2263_v16, 1  ;;  %v2552_v60 = vld [vmem:[%s4666_s3 + $0x5d8] sm:$0xff] }
 0x1e2   : > { %2334 = vst.msk [vmem:[#allocation4 + $0x1f] ss:$8 sm:$0x3] %vm4146_vm1, %v2331_v18  ;;  %2760 = vmatpush1.msra.mxu0 %v2507_v15  ;;  %v1967_v59 = vpop.permute.xlu0 %1966  ;;  %v2580_v4 = vld [vmem:[%s4666_s3 + $0x6b8] sm:$0xff]  ;;  %v2551_v15 = vld [vmem:[%s4666_s3 + $0x5d0] sm:$0xff]  ;;  %v2550_v18 = vld [vmem:[%s4666_s3 + $0x5c8] sm:$0xff] }
 0x1e3   : > { %v2265_v22 = vsel %vm1915_vm8, %v2263_v16, %v2264_v20  ;;  %v1968_v23 = vrot.slane %v1967_v59, 7  ;;  %2761 = vmatprep.subr.mxu0 %v2506_v17  ;;  %v2579_v16 = vld [vmem:[%s4666_s3 + $0x6b0] sm:$0xff]  ;;  %v2578_v20 = vld [vmem:[%s4666_s3 + $0x6a8] sm:$0xff] }
 0x1e4   : > { %2268 = vst.msk [vmem:[#allocation4 + $0x1e] ss:$8 sm:$0x3] %vm4146_vm1, %v2265_v22  ;;  %2762 = vmatpush1.msra.mxu0 %v2505_v21  ;;  %v1898_v34 = vpop.permute.xlu1 %1897  ;;  %v2577_v22 = vld [vmem:[%s4666_s3 + $0x6a0] sm:$0xff] }
 0x1e5   : > { %v1969_v38 = vsel %vm1885_vm13, %v1968_v23, %v1967_v59  ;;  %2763 = vmatprep.subr.mxu0 %v2504_v43  ;;  %v1899_v14 = vrot.slane %v1898_v34, 7  ;;  %v2549_v43 = vld [vmem:[%s4666_s3 + $0x5c0] sm:$0xff] }
 0x1e6   : > { %1972 = vst.msk [vmem:[#allocation4 + $0x21] ss:$8 sm:$0x3] %vm4190_vm5, %v1969_v38  ;;  %2764 = vmatpush1.msra.mxu0 %v2503_v25  ;;  %v2088_v36 = vpop.permute.xlu0 %2087  ;;  %v2548_v25 = vld [vmem:[%s4666_s3 + $0x5b8] sm:$0xff] }
 0x1e7   : > { %v1901_v41 = vsel %vm1900_vm11, %v1899_v14, %v1898_v34  ;;  %v2089_v42 = vrot.slane %v2088_v36, 7  ;;  %2765 = vmatprep.subr.mxu0 %v2502_v35  ;;  %v2360_v56 = vld [vmem:[#allocation4 + $0x10] sm:$0xff]  ;;  %v2547_v14 = vld [vmem:[%s4666_s3 + $0x5b0] sm:$0xff] }
 0x1e8   : > { %1907 = vst.msk [vmem:[#allocation4 + $0x20] ss:$8 sm:$0x3] %vm4190_vm5, %v1901_v41  ;;  %2766 = vmatpush1.msra.mxu0 %v2501_v39  ;;  %v2028_v46 = vpop.permute.xlu1 %2027  ;;  %v2576_v34 = vld [vmem:[%s4666_s3 + $0x698] sm:$0xff]  ;;  %v2575_v39 = vld [vmem:[%s4666_s3 + $0x690] sm:$0xff]  ;;  %v2546_v41 = vld [vmem:[%s4666_s3 + $0x5a8] sm:$0xff] }
 0x1e9   : > { %v2090_v31 = vsel %vm1856_vm4, %v2089_v42, %v2088_v36  ;;  %2767 = vmatprep.subr.mxu0 %v2500_v40  ;;  %v2029_v26 = vrot.slane %v2028_v46, 7  ;;  %v2222_v36 = vld [vmem:[#allocation3 + $0x2d] ss:$8 sm:$0x3] }
 0x1ea   : > { %2093 = vst.msk [vmem:[#allocation4 + $0x23] ss:$8 sm:$0x3] %vm4190_vm5, %v2090_v31  ;;  %2768 = vmatpush1.msra.mxu0 %v2499_v45  ;;  %v1913_v51 = vpop.permute.xlu0 %1912  ;;  %v2574_v42 = vld [vmem:[%s4666_s3 + $0x688] sm:$0xff]  ;;  %v2573_v31 = vld [vmem:[%s4666_s3 + $0x680] sm:$0xff] }
 0x1eb   : > { %v2030_v29 = vsel %vm422_vm0, %v2029_v26, %v2028_v46  ;;  %v1914_v19 = vrot.slane %v1913_v51, 7  ;;  %2769 = vmatprep.subr.mxu0 %v2498_v47  ;;  %v2361_v50 = vld [vmem:[#allocation4 + $0x18] sm:$0xff] }
 0x1ec   : > { %2033 = vst.msk [vmem:[#allocation4 + $0x22] ss:$8 sm:$0x3] %vm4190_vm5, %v2030_v29  ;;  %2770 = vmatpush1.msra.mxu0 %v2497_v48  ;;  %2736 = vmatprep.mubr.f32.mxu1 %v2361_v50  ;;  %v1978_v55 = vpop.permute.xlu1 %1977  ;;  %v2545_v47 = vld [vmem:[%s4666_s3 + $0x5a0] sm:$0xff]  ;;  %v2544_v48 = vld [vmem:[%s4666_s3 + $0x598] sm:$0xff]  ;;  %v2571_v50 = vld [vmem:[%s4666_s3 + $0x670] sm:$0xff] }
 0x1ed   : > { %v1916_v62 = vsel %vm1915_vm8, %v1914_v19, %v1913_v51  ;;  %2771 = vmatprep.subr.mxu0 %v2496_v24  ;;  %v1979_v63 = vrot.slane %v1978_v55, 7  ;;  %2737 = vmatmul.mubr.f32.vlgmr.msra.gmra.mxu1 %v2360_v56  ;;  %v2572_v51 = vld [vmem:[%s4666_s3 + $0x678] sm:$0xff]  ;;  %v2543_v19 = vld [vmem:[%s4666_s3 + $0x590] sm:$0xff] }
 0x1ee   : > { %1922 = vst.msk [vmem:[#allocation4 + $0x28] ss:$8 sm:$0x3] %vm4285_vm12, %v1916_v62  ;;  %2772 = vmatpush1.msra.mxu0 %v2495_v52  ;;  %2815 = vmatpush1.msra.mxu1 %v2587_v54  ;;  %v2039_v32 = vpop.permute.xlu0 %2038  ;;  %v2542_v54 = vld [vmem:[%s4666_s3 + $0x588] sm:$0xff]  ;;  %v2540_v62 = vld [vmem:[%s4666_s3 + $0x578] sm:$0xff] }
 0x1ef   : > { %v1980_v53 = vsel %vm1900_vm11, %v1979_v63, %v1978_v55  ;;  %v2040_v0 = vrot.slane %v2039_v32, 7  ;;  %2773 = vmatprep.subr.mxu0 %v2494_v57  ;;  %2816 = vmatprep.subr.mxu1 %v2586_v58  ;;  %v2570_v55 = vld [vmem:[%s4666_s3 + $0x668] sm:$0xff]  ;;  %v2569_v58 = vld [vmem:[%s4666_s3 + $0x660] sm:$0xff]  ;;  %v2568_v63 = vld [vmem:[%s4666_s3 + $0x658] sm:$0xff] }
 0x1f0   : > { %1983 = vst.msk [vmem:[#allocation4 + $0x29] ss:$8 sm:$0x3] %vm4285_vm12, %v1980_v53  ;;  %2774 = vmatpush1.msra.mxu0 %v2493_v2  ;;  %2817 = vmatpush1.msra.mxu1 %v2585_v3  ;;  %v2099_v7 = vpop.permute.xlu1 %2098  ;;  %v2539_v3 = vld [vmem:[%s4666_s3 + $0x570] sm:$0xff]  ;;  %v2537_v53 = vld [vmem:[%s4666_s3 + $0x560] sm:$0xff] }
 0x1f1   : > { %v2041_v10 = vsel %vm1885_vm13, %v2040_v0, %v2039_v32  ;;  %2775 = vmatprep.subr.mxu0 %v2556_v37  ;;  %2818 = vmatprep.subr.mxu1 %v2584_v30  ;;  %v2100_v11 = vrot.slane %v2099_v7, 7  ;;  %v2567_v32 = vld [vmem:[%s4666_s3 + $0x650] sm:$0xff]  ;;  %v2538_v37 = vld [vmem:[%s4666_s3 + $0x568] sm:$0xff]  ;;  %v2536_v0 = vld [vmem:[%s4666_s3 + $0x558] sm:$0xff] }
 0x1f2   : > { %2044 = vst.msk [vmem:[#allocation4 + $0x2a] ss:$8 sm:$0x3] %vm4285_vm12, %v2041_v10  ;;  %2776 = vmatpush2.msra.mxu0 %v2555_v5  ;;  %2819 = vmatpush1.msra.mxu1 %v2583_v6  ;;  %v2159_v44 = vpop.permute.xlu0 %2158  ;;  %v2566_v30 = vld [vmem:[%s4666_s3 + $0x648] sm:$0xff]  ;;  %v2564_v5 = vld [vmem:[%s4666_s3 + $0x638] sm:$0xff]  ;;  %v2535_v6 = vld [vmem:[%s4666_s3 + $0x550] sm:$0xff] }
 0x1f3   : > { %v2101_v12 = vsel %vm422_vm0, %v2100_v11, %v2099_v7  ;;  %v2160_v13 = vrot.slane %v2159_v44, 7  ;;  %2777 = vmatprep.subr.mxu0 %v2554_v8  ;;  %2820 = vmatprep.subr.mxu1 %v2582_v9  ;;  %v2563_v7 = vld [vmem:[%s4666_s3 + $0x630] sm:$0xff]  ;;  %v2534_v8 = vld [vmem:[%s4666_s3 + $0x548] sm:$0xff]  ;;  %v2533_v10 = vld [vmem:[%s4666_s3 + $0x540] sm:$0xff] }
 0x1f4   : > { %2104 = vst.msk [vmem:[#allocation4 + $0x2b] ss:$8 sm:$0x3] %vm4285_vm12, %v2101_v12  ;;  %2778 = vmatpush2.msra.mxu0 %v2553_v27  ;;  %2821 = vmatpush1.msra.mxu1 %v2581_v33  ;;  %v2214_v17 = vpop.permute.xlu1 %2213  ;;  %v2562_v9 = vld [vmem:[%s4666_s3 + $0x628] sm:$0xff]  ;;  %v2561_v11 = vld [vmem:[%s4666_s3 + $0x620] sm:$0xff]  ;;  %v2532_v27 = vld [vmem:[%s4666_s3 + $0x538] sm:$0xff] }
 0x1f5   : > { %v2161_v21 = vsel %vm1856_vm4, %v2160_v13, %v2159_v44  ;;  %2779 = vmatprep.subr.mxu0 %v2552_v60  ;;  %2822 = vmatprep.subr.mxu1 %v2580_v4  ;;  %v2215_v59 = vrot.slane %v2214_v17, 1  ;;  %v2560_v44 = vld [vmem:[%s4666_s3 + $0x618] sm:$0xff]  ;;  %v2531_v60 = vld [vmem:[%s4666_s3 + $0x530] sm:$0xff]  ;;  %v2530_v12 = vld [vmem:[%s4666_s3 + $0x528] sm:$0xff] }
 0x1f6   : > { %2164 = vst.msk [vmem:[#allocation4 + $0x2c] ss:$8 sm:$0x3] %vm4285_vm12, %v2161_v21  ;;  %2780 = vmatpush2.msra.mxu0 %v2551_v15  ;;  %2823 = vmatpush1.msra.mxu1 %v2579_v16  ;;  %v2274_v23 = vpop.permute.xlu0 %2273  ;;  %v2559_v4 = vld [vmem:[%s4666_s3 + $0x610] sm:$0xff]  ;;  %v2558_v13 = vld [vmem:[%s4666_s3 + $0x608] sm:$0xff]  ;;  %v2529_v15 = vld [vmem:[%s4666_s3 + $0x520] sm:$0xff] }
 0x1f7   : > { %v2216_v35 = vsel %vm1930_vm7, %v2214_v17, %v2215_v59  ;;  %v2275_v38 = vrot.slane %v2274_v23, 1  ;;  %2781 = vmatprep.subr.mxu0 %v2550_v18  ;;  %2824 = vmatprep.subr.mxu1 %v2578_v20  ;;  %v2557_v16 = vld [vmem:[%s4666_s3 + $0x600] sm:$0xff]  ;;  %v2528_v17 = vld [vmem:[%s4666_s3 + $0x518] sm:$0xff]  ;;  %v2527_v18 = vld [vmem:[%s4666_s3 + $0x510] sm:$0xff] }
 0x1f8   : > { %2219 = vst.msk [vmem:[#allocation4 + $0x25] ss:$8 sm:$0x3] %vm4190_vm5, %v2216_v35  ;;  %2782 = vmatpush2.msra.mxu0 %v2549_v43  ;;  %2825 = vmatpush1.msra.mxu1 %v2577_v22  ;;  %v2340_v40 = vpop.permute.xlu1 %2339  ;;  %v2526_v21 = vld [vmem:[%s4666_s3 + $0x508] sm:$0xff]  ;;  %v2525_v59 = vld [vmem:[%s4666_s3 + $0x500] sm:$0xff]  ;;  %v2902_v22 = vld [vmem:[%s4668_s5 + $0x78] sm:$0xff] }
 0x1f9   : > { %2224 = vst.msk [vmem:[#allocation4 + $0x2d] ss:$8 sm:$0x3] %vm4285_vm12, %v2222_v36  ;;  %v2276_v45 = vsel %vm1991_vm6, %v2274_v23, %v2275_v38  ;;  %2783 = vmatprep.subr.mxu0 %v2548_v25  ;;  %2826 = vmatprep.subr.mxu1 %v2576_v34  ;;  %v2341_v46 = vrot.slane %v2340_v40, 1  ;;  %v2917_v23 = vld [vmem:[%s4668_s5 + $0xf0] sm:$0xff]  ;;  %v2916_v34 = vld [vmem:[%s4668_s5 + $0xe8] sm:$0xff] }
 0x1fa   : > { %2279 = vst.msk [vmem:[#allocation4 + $0x26] ss:$8 sm:$0x3] %vm4190_vm5, %v2276_v45  ;;  %2784 = vmatpush2.msra.mxu0 %v2547_v14  ;;  %2827 = vmatpush1.msra.mxu1 %v2575_v39  ;;  %v2351_v26 = vpop.permute.xlu0 %2350  ;;  %v2901_v25 = vld [vmem:[%s4668_s5 + $0x70] sm:$0xff]  ;;  %v2900_v35 = vld [vmem:[%s4668_s5 + $0x68] sm:$0xff]  ;;  %v2915_v38 = vld [vmem:[%s4668_s5 + $0xe0] sm:$0xff] }
 0x1fb   : > { %v2342_v24 = vsel %vm1915_vm8, %v2340_v40, %v2341_v46  ;;  %v2352_v29 = vrot.slane %v2351_v26, 1  ;;  %2785 = vmatprep.subr.mxu0 %v2546_v41  ;;  %2828 = vmatprep.subr.mxu1 %v2574_v42  ;;  %v2899_v14 = vld [vmem:[%s4668_s5 + $0x60] sm:$0xff]  ;;  %v2914_v39 = vld [vmem:[%s4668_s5 + $0xd8] sm:$0xff]  ;;  %v2913_v40 = vld [vmem:[%s4668_s5 + $0xd0] sm:$0xff] }
 0x1fc   : > { %2345 = vst.msk [vmem:[#allocation4 + $0x27] ss:$8 sm:$0x3] %vm4190_vm5, %v2342_v24  ;;  %2786 = vmatpush2.msra.mxu0 %v2545_v47  ;;  %2829 = vmatpush1.msra.mxu1 %v2573_v31  ;;  %v2285_v52 = vpop.permute.xlu1 %2284  ;;  %v2898_v36 = vld [vmem:[%s4668_s5 + $0x58] sm:$0xff]  ;;  %v2897_v41 = vld [vmem:[%s4668_s5 + $0x50] sm:$0xff]  ;;  %v2912_v42 = vld [vmem:[%s4668_s5 + $0xc8] sm:$0xff] }
 0x1fd   : > { %v2353_v56 = vsel %vm1991_vm6, %v2351_v26, %v2352_v29  ;;  %2787 = vmatprep.subr.mxu0 %v2544_v48  ;;  %2830 = vmatprep.subr.mxu1 %v2572_v51  ;;  %v2286_v57 = vrot.slane %v2285_v52, 1  ;;  %v2896_v45 = vld [vmem:[%s4668_s5 + $0x48] sm:$0xff]  ;;  %v2911_v46 = vld [vmem:[%s4668_s5 + $0xc0] sm:$0xff]  ;;  %v2910_v31 = vld [vmem:[%s4668_s5 + $0xb8] sm:$0xff] }
 0x1fe   : > { %2356 = vst.msk [vmem:[#allocation4 + $0x2f] ss:$8 sm:$0x3] %vm4285_vm12, %v2353_v56  ;;  %2788 = vmatpush2.msra.mxu0 %v2543_v19  ;;  %2831 = vmatpush1.msra.mxu1 %v2571_v50  ;;  %v2895_v47 = vld [vmem:[%s4668_s5 + $0x40] sm:$0xff]  ;;  %v2894_v26 = vld [vmem:[%s4668_s5 + $0x38] sm:$0xff]  ;;  %v2909_v48 = vld [vmem:[%s4668_s5 + $0xb0] sm:$0xff] }
 0x1ff   : > { %v2287_v2 = vsel %vm1930_vm7, %v2285_v52, %v2286_v57  ;;  %2789 = vmatprep.subr.mxu0 %v2542_v54  ;;  %2832 = vmatprep.subr.mxu1 %v2570_v55  ;;  %v2893_v51 = vld [vmem:[%s4668_s5 + $0x30] sm:$0xff]  ;;  %v2908_v24 = vld [vmem:[%s4668_s5 + $0xa8] sm:$0xff]  ;;  %v2907_v19 = vld [vmem:[%s4668_s5 + $0xa0] sm:$0xff] }
 0x200   : > { %2290 = vst.msk [vmem:[#allocation4 + $0x2e] ss:$8 sm:$0x3] %vm4285_vm12, %v2287_v2  ;;  %2790 = vmatpush2.msra.mxu0 %v2541_v61  ;;  %2833 = vmatpush1.msra.mxu1 %v2569_v58  ;;  %v2892_v29 = vld [vmem:[%s4668_s5 + $0x28] sm:$0xff]  ;;  %v2891_v50 = vld [vmem:[%s4668_s5 + $0x20] sm:$0xff]  ;;  %v2906_v52 = vld [vmem:[%s4668_s5 + $0x98] sm:$0xff] }
 0x201   : > { %2791 = vmatprep.subr.mxu0 %v2540_v62  ;;  %2834 = vmatprep.subr.mxu1 %v2568_v63  ;;  %v2890_v54 = vld [vmem:[%s4668_s5 + $0x18] sm:$0xff]  ;;  %v2905_v55 = vld [vmem:[%s4668_s5 + $0x90] sm:$0xff]  ;;  %v2904_v57 = vld [vmem:[%s4668_s5 + $0x88] sm:$0xff]  ;;  %v2592_v63 = vshrl.u32 %v1844_v28, 7 }
 0x202   : > { %2792 = vmatpush2.msra.mxu0 %v2539_v3  ;;  %2835 = vmatpush1.msra.mxu1 %v2567_v32  ;;  %v2889_v56 = vld [vmem:[%s4668_s5 + $0x10] sm:$0xff]  ;;  %v2888_v61 = vld [vmem:[%s4668_s5 + $0x8] sm:$0xff]  ;;  %v2903_v58 = vld [vmem:[%s4668_s5 + $0x80] sm:$0xff] }
 0x203   : > { %2793 = vmatprep.subr.mxu0 %v2538_v37  ;;  %2836 = vmatprep.subr.mxu1 %v2566_v30  ;;  %v2362_v43 = vld [vmem:[#allocation4 + $0x20] sm:$0xff]  ;;  %v2887_v62 = vld [vmem:[%s4668_s5] sm:$0xff]  ;;  %v2593_v2 = vsub.s32 0, %v2592_v63  ;;  %v2597_v32 = vsub.s32 1, %v2592_v63 }
 0x204   : > { %2794 = vmatpush2.msra.mxu0 %v2537_v53  ;;  %2837 = vmatpush1.msra.mxu1 %v2565_v49  ;;  %v2589_v3 = vld [vmem:[%s4667_s4] sm:$0x3] }
 0x205   : > { %2795 = vmatprep.subr.mxu0 %v2536_v0  ;;  %2838 = vmatprep.subr.mxu1 %v2564_v5  ;;  %v2594_v30 = vrot.slane %v2589_v3, %v2593_v2  ;;  %v2598_v49 = vrot.slane %v2589_v3, %v2597_v32 }
 0x206   : > { %2796 = vmatpush2.msra.mxu0 %v2535_v6  ;;  %2839 = vmatpush1.msra.mxu1 %v2563_v7 }
 0x207   : > { %2797 = vmatprep.subr.mxu0 %v2534_v8  ;;  %2840 = vmatprep.subr.mxu1 %v2562_v9  ;;  %v2363_v33 = vld [vmem:[#allocation4 + $0x28] sm:$0xff]  ;;  %v2364_v20 = vld [vmem:[#allocation4 + $0x30] sm:$0xff] }
 0x208   : > { %2798 = vmatpush2.msra.mxu0 %v2533_v10  ;;  %2841 = vmatpush1.msra.mxu1 %v2561_v11 }
 0x209   : > { %2799 = vmatprep.subr.mxu0 %v2532_v27  ;;  %2807 = vmatprep.mubr.f32.mxu0 %v2363_v33 }
 0x20a   : > { %2842 = vmatprep.subr.mxu1 %v2560_v44  ;;  %2800 = vmatpush2.msra.mxu0 %v2531_v60 }
 0x20b   : > { %2843 = vmatpush1.msra.mxu1 %v2559_v4  ;;  %2801 = vmatprep.subr.mxu0 %v2530_v12 }
 0x20c   : > { %2844 = vmatprep.subr.mxu1 %v2558_v13  ;;  %2802 = vmatpush2.msra.mxu0 %v2529_v15 }
 0x20d   : > { %2845 = vmatpush1.msra.mxu1 %v2557_v16  ;;  %2878 = vmatprep.mubr.f32.mxu1 %v3246_v1  ;;  %v2918_v1 = vld [vmem:[%s4668_s5 + $0xf8] sm:$0xff]  ;;  %v3094_v16 = vld [vmem:[%s4669_s6] ss:$0 sm:$0xff] }
 0x20e   : > { %2803 = vmatprep.subr.mxu0 %v2528_v17  ;;  %2879 = vmatmul.mubr.f32.vlgmr.msra.gmra.mxu1 %v2364_v20 }
 0x20f   : > { %2804 = vmatpush2.msra.mxu0 %v2527_v18  ;;  %3099 = vmatprep.subr.mxu1 %v2918_v1 }
 0x210   : > { %2805 = vmatprep.subr.mxu0 %v2526_v21  ;;  %3100 = vmatpush3.msra.mxu1 %v2902_v22 }
 0x211   : > { %2806 = vmatpush2.msra.mxu0 %v2525_v59  ;;  %3101 = vmatprep.subr.mxu1 %v2917_v23 }
 0x212   : > { %2808 = vmatmul.mubr.f32.vlgmr.msra.gmra.mxu0 %v2362_v43  ;;  %3102 = vmatpush3.msra.mxu1 %v2901_v25 }
 0x213   : > { %3103 = vmatprep.subr.mxu1 %v2916_v34 }
 0x214   : > { %3104 = vmatpush3.msra.mxu1 %v2900_v35 }
 0x215   : > { %3105 = vmatprep.subr.mxu1 %v2915_v38 }
 0x216   : > { %3106 = vmatpush3.msra.mxu1 %v2899_v14 }
 0x217   : > { %3107 = vmatprep.subr.mxu1 %v2914_v39 }
 0x218   : > { %3108 = vmatpush3.msra.mxu1 %v2898_v36 }
 0x219   : > { %3109 = vmatprep.subr.mxu1 %v2913_v40 }
 0x21a   : > { %3110 = vmatpush3.msra.mxu1 %v2897_v41 }
 0x21b   : > { %3111 = vmatprep.subr.mxu1 %v2912_v42 }
 0x21c   : > { %3112 = vmatpush3.msra.mxu1 %v2896_v45 }
 0x21d   : > { %3113 = vmatprep.subr.mxu1 %v2911_v46 }
 0x21e   : > { %3114 = vmatpush3.msra.mxu1 %v2895_v47 }
 0x21f   : > { %3115 = vmatprep.subr.mxu1 %v2910_v31 }
 0x220   : > { %3116 = vmatpush3.msra.mxu1 %v2894_v26 }
 0x221   : > { %3117 = vmatprep.subr.mxu1 %v2909_v48 }
 0x222   : > { %3118 = vmatpush3.msra.mxu1 %v2893_v51 }
 0x223   : > { %3119 = vmatprep.subr.mxu1 %v2908_v24 }
 0x224   : > { %3120 = vmatpush3.msra.mxu1 %v2892_v29 }
 0x225   : > { %3121 = vmatprep.subr.mxu1 %v2907_v19 }
 0x226   : > { %3122 = vmatpush3.msra.mxu1 %v2891_v50 }
 0x227   : > { %3123 = vmatprep.subr.mxu1 %v2906_v52 }
 0x228   : > { %3124 = vmatpush3.msra.mxu1 %v2890_v54 }
 0x229   : > { %3125 = vmatprep.subr.mxu1 %v2905_v55 }
 0x22a   : > { %3126 = vmatpush3.msra.mxu1 %v2889_v56 }
 0x22b   : > { %3127 = vmatprep.subr.mxu1 %v2904_v57 }
 0x22c   : > { %3128 = vmatpush3.msra.mxu1 %v2888_v61 }
 0x22d   : > { %3129 = vmatprep.subr.mxu1 %v2903_v58 }
 0x22e   : > { %3130 = vmatpush3.msra.mxu1 %v2887_v62 }
 0x291   : > { %v2667_v37 = vpop.f32.mrf.mxu0 }
 0x292   : > { %v2668_v5 = vadd.f32 %v2667_v37, %v2594_v30 }
 0x293   : > { %v2669_v0 = vpop.f32.mrf.mxu0 }
 0x294   : > { %v2670_v7 = vadd.f32 %v2669_v0, %v2598_v49 }
 0x2ad   : > { %v2738_v53 = vpop.f32.mrf.mxu1 }
 0x2ae   : > { %v2739_v8 = vadd.f32 %v2738_v53, %v2668_v5 }
 0x2af   : > { %v2740_v6 = vpop.f32.mrf.mxu1 }
 0x2b0   : > { %v2741_v11 = vadd.f32 %v2740_v6, %v2670_v7 }
 0x2ce   : > { %v2880_v9 = vpop.f32.mrf.mxu1 }
 0x2d0   : > { %v2882_v44 = vpop.f32.mrf.mxu1 }
 0x2d2   : > { %v2809_v10 = vpop.f32.mrf.mxu0 }
 0x2d3   : > { %v2810_v28 = vadd.f32 %v2809_v10, %v2739_v8 }
 0x2d4   : > { %v2811_v27 = vpop.f32.mrf.mxu0 }
 0x2d5   : > { %v2812_v33 = vadd.f32 %v2811_v27, %v2741_v11  ;;  %v2881_v60 = vadd.f32 %v2880_v9, %v2810_v28 }
 0x2d7   : > { %v2883_v4 = vadd.f32 %v2882_v44, %v2812_v33  ;;  %v2885_v13 = vmax.f32 %v2881_v60, 0.0 }
 0x2d9   : > { %v2886_v12 = vmax.f32 %v2883_v4, 0.0 }
 0x2db   : > { %2990 = vmatprep.mubr.f32.mxu1 %v2886_v12 }
 0x2dc   : > { %2991 = vmatmul.mubr.f32.vlgmr.msra.gmra.mxu1 %v2885_v13 }
 0x39c   : > { %v3131_v15 = vpop.f32.mrf.mxu1 }
 0x39e   : > { %v3132_v17 = vpop.f32.mrf.mxu1 }
 0x39f   : > { %v3133_v18 = vadd.f32 %v3132_v17, %v3131_v15 }
 0x3a1   : > { %v2993_v20 = vadd.f32 %v3133_v18, %v3094_v16 }
 0x3a3   : > { %2996 = vst [vmem:[%s271_s14] sm:$0xff] %v2993_v20 }
 0x3a4   : > { %3197 = shalt.err (!%p3194_p3)
}
 0x3a5   : > { %s3198_s9 = scalar_lea.hbm %s3009_s29, 128  ;;  %s3202_s16 = scalar_lea.hbm %s4670_s7, 256 }
 0x3a6   : > { %p3199_p4 = scmp.ne.s32.totalorder %s3009_s29, %s3198_s9  ;;  %p3203_p9 = scmp.lt.s32.totalorder %s3009_s29, %s4670_s7 }
 0x3a7   : > { %p3204_p10 = scmp.lt.s32.totalorder %s3202_s16, %s3198_s9 }
 0x3a8   : > { %p3200_p7 = pnand %p3199_p4, %p3334_p5 }
 0x3a9   : > { %p3205_p11 = por %p3204_p10, %p3203_p9 }
 0x3aa   : > { %p3201_p8 = pneg %p3200_p7 }
 0x3ac   : > { %p3206_p12 = pnand %p3205_p11, %p3201_p8 }
 0x3ae   : > { %3209 = shalt.err (!%p3206_p12)
}
 0x3af   : > { %3135 = dma.vmem_to_hbm [thread:$0]  (%p3334_p5), %s3012_s18, 128, %s3009_s29, %s2998_s19  }
 0x3b0 PF: > { %p3141_p13 = scmp.ge.s32.totalorder %s3244_s27, 2  ;;  %s3023_s23 = sand.u32 1, %s3232_s24  }
 0x3b1   : > { %s3024_s17 = scalar_lea.sflag [#allocation6], %s3023_s23 }
 0x3b2   : > { %p3138_p0 = pnand %p3141_p13, %p3338_p6 }
 0x3b4   : > { %p3139_p1 = pneg %p3138_p0 }
 0x3b6   : > { %3227 = dma.done.wait (%p3139_p1), %s3024_s17, 128  }
 0x3b7   : > { %3229 = vsyncadd (%p3139_p1), %s3024_s17, 4294967168  ;;  %p17_p2 = scmp.ge.s32.totalorder %s3321_s30, 4   ;;  %s4700_s24 = smov %s3236_s25 }
 0x3b8   : > { %s4701_s25 = smov %s3240_s26  ;;  %s4702_s26 = smov %s3332_s10 }
 0x3b9   : > { %s4703_s27 = smov %s3321_s30  ;;  %19 = sbr.rel (!%p17_p2) target bundleno = 3 (0x3), region = 177 }
 0x3be   :  { %3029 = vsyncpa [#allocation6], 1 }
 0x3bf   :  { %3031 = vsyncpa [#allocation6 + $0x1], 1 }

</bundles_post_ra>
